<compile_context>
chip_gen: v7x
topology: tpu7x:2x2x1
jax: 0.10.0
libtpu: 0.0.40
codegen_flags: <defaults>
</compile_context>

<pallas_src>
import functools

import jax
import jax.numpy as jnp
from jax import lax
from jax.experimental import pallas as pl
from jax.experimental.pallas import tpu as pltpu


def _vmem_limit_bytes():
    """Generation-aware scoped-VMEM budget (~75% of per-core VMEM, capped at 100 MiB)."""
    cap = 64 * 1024 * 1024
    try:
        info = pltpu.get_tpu_info()
        cap = int(getattr(info, "vmem_capacity_bytes", cap))
    except Exception:
        pass
    return min(cap * 3 // 4, 100 * 1024 * 1024)


_VMEM_LIMIT = _vmem_limit_bytes()


def _pick_tile(dim, target, align):
    """Largest `align`-aligned divisor of `dim` that is <= target.

    Falls back to the full extent only when no aligned divisor exists
    (block == full dim is always layout-legal), never as a silent VMEM cliff
    for ordinary non-divisible shapes.
    """
    if dim <= target:
        return dim
    if dim % align == 0:
        t = (target // align) * align
        while t >= align:
            if dim % t == 0:
                return t
            t -= align
    return dim


def _gelu_tanh(y):
    return 0.5 * y * (1.0 + jnp.tanh(0.7978845608028654 * (y + 0.044715 * y * y * y)))


# --------------------------------------------------------------------------
# Tiled dense:  y = act(x @ w + b)    (bf16 operands, f32 accumulation)
# --------------------------------------------------------------------------

def _dense_kernel(x_ref, w_ref, b_ref, o_ref, acc_ref, *, activation):
    @pl.when(pl.program_id(2) == 0)
    def _():
        acc_ref[...] = jnp.zeros_like(acc_ref)

    acc_ref[...] += jnp.dot(x_ref[...].astype(jnp.bfloat16), w_ref[...],
                            preferred_element_type=jnp.float32)

    @pl.when(pl.program_id(2) == pl.num_programs(2) - 1)
    def _():
        y = acc_ref[...] + b_ref[...]
        if activation == "gelu":
            y = _gelu_tanh(y)
        elif activation == "tanh":
            y = jnp.tanh(y)
        o_ref[...] = y.astype(o_ref.dtype)


def dense(x, w, b, activation=None, *, out_dtype=jnp.bfloat16,
          tm=512, tn=512, tk=512):
    M, K = x.shape
    N = w.shape[1]
    tm = _pick_tile(M, tm, 8)
    tn = _pick_tile(N, tn, 128)
    tk = _pick_tile(K, tk, 128)
    grid = (M // tm, N // tn, K // tk)
    kernel = functools.partial(_dense_kernel, activation=activation)
    return pl.pallas_call(
        kernel,
        out_shape=jax.ShapeDtypeStruct((M, N), out_dtype),
        grid=grid,
        in_specs=[
            pl.BlockSpec((tm, tk), lambda i, j, k: (i, k)),
            pl.BlockSpec((tk, tn), lambda i, j, k: (k, j)),
            pl.BlockSpec((1, tn), lambda i, j, k: (0, j)),
        ],
        out_specs=pl.BlockSpec((tm, tn), lambda i, j, k: (i, j)),
        scratch_shapes=[pltpu.VMEM((tm, tn), jnp.float32)],
        compiler_params=pltpu.CompilerParams(
            dimension_semantics=("parallel", "parallel", "arbitrary"),
            vmem_limit_bytes=_VMEM_LIMIT),
    )(x, w, b.reshape(1, N))


# --------------------------------------------------------------------------
# Fused dense + bias + residual-add + LayerNorm  (hidden dim un-tiled; the f32
# output block is the accumulator — it stays resident across the K axis)
# --------------------------------------------------------------------------

def _dense_res_ln_kernel(x_ref, w_ref, b_ref, r_ref, g_ref, bt_ref, o_ref, *, eps):
    @pl.when(pl.program_id(1) == 0)
    def _():
        o_ref[...] = jnp.zeros_like(o_ref)

    o_ref[...] += jnp.dot(x_ref[...].astype(jnp.bfloat16), w_ref[...],
                          preferred_element_type=jnp.float32)

    @pl.when(pl.program_id(1) == pl.num_programs(1) - 1)
    def _():
        y = o_ref[...] + b_ref[...] + r_ref[...]
        mean = jnp.mean(y, axis=-1, keepdims=True)
        c = y - mean
        var = jnp.mean(c * c, axis=-1, keepdims=True)
        o_ref[...] = c * lax.rsqrt(var + eps) * g_ref[...] + bt_ref[...]


def dense_residual_layernorm(x, w, b, residual, gamma, beta, *,
                             eps=1e-12, tm=512, tk=512):
    M, K = x.shape
    N = w.shape[1]                      # full hidden width (needed for LN stats)
    tm = _pick_tile(M, tm, 8)
    tk = _pick_tile(K, tk, 128)
    grid = (M // tm, K // tk)
    kernel = functools.partial(_dense_res_ln_kernel, eps=eps)
    return pl.pallas_call(
        kernel,
        out_shape=jax.ShapeDtypeStruct((M, N), jnp.float32),
        grid=grid,
        in_specs=[
            pl.BlockSpec((tm, tk), lambda i, k: (i, k)),
            pl.BlockSpec((tk, N), lambda i, k: (k, 0)),
            pl.BlockSpec((1, N), lambda i, k: (0, 0)),
            pl.BlockSpec((tm, N), lambda i, k: (i, 0)),
            pl.BlockSpec((1, N), lambda i, k: (0, 0)),
            pl.BlockSpec((1, N), lambda i, k: (0, 0)),
        ],
        out_specs=pl.BlockSpec((tm, N), lambda i, k: (i, 0)),
        compiler_params=pltpu.CompilerParams(
            dimension_semantics=("parallel", "arbitrary"),
            vmem_limit_bytes=_VMEM_LIMIT),
    )(x, w, b.reshape(1, N), residual, gamma.reshape(1, N), beta.reshape(1, N))


# --------------------------------------------------------------------------
# Plain LayerNorm (embeddings), tiled over rows
# --------------------------------------------------------------------------

def _ln_kernel(x_ref, g_ref, b_ref, o_ref, *, eps):
    x = x_ref[...]
    mean = jnp.mean(x, axis=-1, keepdims=True)
    c = x - mean
    var = jnp.mean(c * c, axis=-1, keepdims=True)
    o_ref[...] = c * lax.rsqrt(var + eps) * g_ref[...] + b_ref[...]


def layernorm(x, gamma, beta, *, eps=1e-12, tm=512):
    M, H = x.shape
    tm = _pick_tile(M, tm, 8)
    grid = (M // tm,)
    return pl.pallas_call(
        functools.partial(_ln_kernel, eps=eps),
        out_shape=jax.ShapeDtypeStruct((M, H), jnp.float32),
        grid=grid,
        in_specs=[
            pl.BlockSpec((tm, H), lambda i: (i, 0)),
            pl.BlockSpec((1, H), lambda i: (0, 0)),
            pl.BlockSpec((1, H), lambda i: (0, 0)),
        ],
        out_specs=pl.BlockSpec((tm, H), lambda i: (i, 0)),
        compiler_params=pltpu.CompilerParams(
            dimension_semantics=("parallel",),
            vmem_limit_bytes=_VMEM_LIMIT),
    )(x, gamma.reshape(1, H), beta.reshape(1, H))


# --------------------------------------------------------------------------
# Attention: one batch element per grid step, all heads inside the kernel.
# Input is the fused QKV slab [B, S, 3H] (bf16); output [B, S, H] (bf16),
# written with ONE lane-dense store per grid step via an (S, H) VMEM scratch.
# --------------------------------------------------------------------------

def _attn_kernel(qkv_ref, m_ref, o_ref, ctx_ref, *, n_heads, d_head, scale):
    H = n_heads * d_head
    s_len = qkv_ref.shape[1]

    # Hoisted loop-invariant work: scale Q once over the whole slab, broadcast the
    # mask to (S, S) once (JAX does not CSE broadcast_in_dim across the head loop).
    q_all = (qkv_ref[0, :, :H].astype(jnp.float32) * scale).astype(jnp.bfloat16)
    mask2d = jnp.broadcast_to(m_ref[0], (s_len, s_len))

    # TODO(synk): for S >~ 1k or many heads, switch to a KV-tiled (flash-style) online
    # softmax with heads on a grid axis; the static unroll is appropriate at small S.
    for h in range(n_heads):
        q = q_all[:, h * d_head:(h + 1) * d_head]                        # (S, dh) bf16
        k = qkv_ref[0, :, H + h * d_head:H + (h + 1) * d_head]           # (S, dh) bf16
        v = qkv_ref[0, :, 2 * H + h * d_head:2 * H + (h + 1) * d_head]   # (S, dh) bf16
        # contract on the last dim of both operands -> no JAX-level k transpose
        s = lax.dot_general(q, k, (((1,), (1,)), ((), ())),
                            preferred_element_type=jnp.float32)
        s = s + mask2d
        s = s - jnp.max(s, axis=-1, keepdims=True)
        p = jnp.exp(s)
        p = p * pl.reciprocal(jnp.sum(p, axis=-1, keepdims=True), approx=True)
        ctx_ref[:, h * d_head:(h + 1) * d_head] = jnp.dot(
            p.astype(jnp.bfloat16), v, preferred_element_type=jnp.float32)

    # single lane-dense store of the merged heads
    o_ref[0, :, :] = ctx_ref[...].astype(o_ref.dtype)


def attention(qkv, mask_bias, n_heads, d_head, scale):
    """qkv: [B, S, 3H] bf16, mask_bias: [B, 1, S] f32 -> context [B, S, H] bf16."""
    B, S, H3 = qkv.shape
    H = H3 // 3
    kernel = functools.partial(_attn_kernel, n_heads=n_heads, d_head=d_head,
                               scale=scale)
    return pl.pallas_call(
        kernel,
        out_shape=jax.ShapeDtypeStruct((B, S, H), jnp.bfloat16),
        grid=(B,),
        in_specs=[
            pl.BlockSpec((1, S, H3), lambda b: (b, 0, 0)),
            pl.BlockSpec((1, 1, S), lambda b: (b, 0, 0)),
        ],
        out_specs=pl.BlockSpec((1, S, H), lambda b: (b, 0, 0)),
        scratch_shapes=[pltpu.VMEM((S, H), jnp.float32)],
        compiler_params=pltpu.CompilerParams(
            dimension_semantics=("parallel",),
            vmem_limit_bytes=_VMEM_LIMIT),
    )(qkv, mask_bias)


# --------------------------------------------------------------------------
# Fused pooler (tanh dense on CLS) + eval-mode dropout (identity) + classifier
# --------------------------------------------------------------------------

def _pooler_classifier_kernel(x_ref, wp_ref, bp_ref, wc_ref, bc_ref, o_ref):
    pooled = jnp.tanh(
        jnp.dot(x_ref[...].astype(jnp.bfloat16), wp_ref[...],
                preferred_element_type=jnp.float32) + bp_ref[...])
    # dropout: eval mode => identity
    o_ref[...] = (jnp.dot(pooled.astype(jnp.bfloat16), wc_ref[...],
                          preferred_element_type=jnp.float32) + bc_ref[...])


def pooler_classifier(cls_tok, wp, bp, wc, bc):
    B, H = cls_tok.shape
    L = wc.shape[1]
    return pl.pallas_call(
        _pooler_classifier_kernel,
        out_shape=jax.ShapeDtypeStruct((B, L), jnp.float32),
        grid=(1,),
        in_specs=[
            pl.BlockSpec((B, H), lambda i: (0, 0)),
            pl.BlockSpec((H, H), lambda i: (0, 0)),
            pl.BlockSpec((1, H), lambda i: (0, 0)),
            pl.BlockSpec((H, L), lambda i: (0, 0)),
            pl.BlockSpec((1, L), lambda i: (0, 0)),
        ],
        out_specs=pl.BlockSpec((B, L), lambda i: (0, 0)),
        compiler_params=pltpu.CompilerParams(
            dimension_semantics=("arbitrary",),
            vmem_limit_bytes=_VMEM_LIMIT),
    )(cls_tok, wp, bp.reshape(1, H), wc, bc.reshape(1, L))


# --------------------------------------------------------------------------
# Parameters (deterministic, synthetic); matmul weights stored in bf16,
# QKV weights pre-fused as [H, 3H]; biases / LN params / embeddings in f32.
# --------------------------------------------------------------------------

def init_params(key, cfg):
    H, I = cfg["hidden"], cfg["intermediate"]
    keys = iter(jax.random.split(key, 64))

    def wf32(shape, scale=0.02):
        return (scale * jax.random.normal(next(keys), shape)).astype(jnp.float32)

    def wbf16(shape, scale=0.02):
        return (scale * jax.random.normal(next(keys), shape)).astype(jnp.bfloat16)

    params = {
        "word_emb": wf32((cfg["vocab"], H)),
        "pos_emb": wf32((cfg["max_pos"], H)),
        "type_emb": wf32((cfg["type_vocab"], H)),
        "emb_ln_g": jnp.ones((H,), jnp.float32),
        "emb_ln_b": jnp.zeros((H,), jnp.float32),
        "pool_w": wbf16((H, H)),
        "pool_b": jnp.zeros((H,), jnp.float32),
        "cls_w": wbf16((H, cfg["num_labels"])),
        "cls_b": jnp.zeros((cfg["num_labels"],), jnp.float32),
        "layers": [],
    }
    for _ in range(cfg["layers"]):
        params["layers"].append({
            "wqkv": wbf16((H, 3 * H)),                   # fused Wq | Wk | Wv
            "bqkv": jnp.zeros((3 * H,), jnp.float32),
            "wo": wbf16((H, H)), "bo": jnp.zeros((H,), jnp.float32),
            "ln1_g": jnp.ones((H,), jnp.float32), "ln1_b": jnp.zeros((H,), jnp.float32),
            "wi": wbf16((H, I)), "bi": jnp.zeros((I,), jnp.float32),
            "wo2": wbf16((I, H)), "bo2": jnp.zeros((H,), jnp.float32),
            "ln2_g": jnp.ones((H,), jnp.float32), "ln2_b": jnp.zeros((H,), jnp.float32),
        })
    return params


# --------------------------------------------------------------------------
# IntentModel.forward equivalent
# --------------------------------------------------------------------------

def intent_model_forward(params, input_ids, attention_mask, token_type_ids, cfg):
    B, S = input_ids.shape
    H = cfg["hidden"]
    nH = cfg["heads"]
    dh = H // nH
    scale = 1.0 / (dh ** 0.5)

    # --- BERT embeddings (gather is plain-JAX glue) ---
    # TODO(synk): embedding gathers stay in plain JAX (no clean Pallas TPU gather here).
    pos_ids = jnp.arange(S)
    x = (params["word_emb"][input_ids]
         + params["pos_emb"][pos_ids][None, :, :]
         + params["type_emb"][token_type_ids])
    xf = layernorm(x.reshape(B * S, H), params["emb_ln_g"], params["emb_ln_b"])

    # Extended attention mask: (1 - mask) * -10000, shape [B, 1, S]
    mask_bias = ((1.0 - attention_mask.astype(jnp.float32)) * -10000.0
                 ).reshape(B, 1, S)

    # --- Transformer encoder layers (5 pallas_calls each) ---
    for layer in params["layers"]:
        qkv = dense(xf, layer["wqkv"], layer["bqkv"])              # [B*S, 3H] bf16
        ctx = attention(qkv.reshape(B, S, 3 * H), mask_bias, nH, dh, scale)
        x1 = dense_residual_layernorm(ctx.reshape(B * S, H), layer["wo"],
                                      layer["bo"], xf,
                                      layer["ln1_g"], layer["ln1_b"])
        inter = dense(x1, layer["wi"], layer["bi"], activation="gelu")  # bf16
        xf = dense_residual_layernorm(inter, layer["wo2"], layer["bo2"], x1,
                                      layer["ln2_g"], layer["ln2_b"])

    # --- pooler + dropout(eval) + classifier, fused ---
    cls_tok = xf.reshape(B, S, H)[:, 0, :]                         # [B, H] f32
    logits = pooler_classifier(cls_tok, params["pool_w"], params["pool_b"],
                               params["cls_w"], params["cls_b"])
    return logits


# --------------------------------------------------------------------------

if __name__ == "__main__":
    cfg = dict(vocab=50, hidden=32, heads=4, layers=2, intermediate=64,
               max_pos=16, type_vocab=2, num_labels=4)

    key = jax.random.PRNGKey(0)
    pkey, dkey = jax.random.split(key)
    params = init_params(pkey, cfg)

    B, S = 2, 8
    input_ids = jax.random.randint(dkey, (B, S), 0, cfg["vocab"], dtype=jnp.int32)
    attention_mask = jnp.ones((B, S), dtype=jnp.int32).at[1, 6:].set(0)
    token_type_ids = jnp.zeros((B, S), dtype=jnp.int32)

    fwd = jax.jit(functools.partial(intent_model_forward, cfg=cfg))
    logits = fwd(params, input_ids, attention_mask, token_type_ids)
    logits = jax.block_until_ready(logits)
    assert logits.shape == (B, cfg["num_labels"])
    assert bool(jnp.all(jnp.isfinite(logits)))
    print("KERNEL_OK")
</pallas_src>

<mosaic_0001>
module attributes {stable_mosaic.version = 11 : i64} {
  func.func @_ln_kernel(%arg0: i32, %arg1: memref<16x32xf32, #tpu.memory_space<vmem>>, %arg2: memref<1x32xf32, #tpu.memory_space<vmem>>, %arg3: memref<1x32xf32, #tpu.memory_space<vmem>>, %arg4: memref<16x32xf32, #tpu.memory_space<vmem>>) attributes {dimension_semantics = [#tpu.dimension_semantics<parallel>], iteration_bounds = array<i64: 1>, scalar_prefetch = 0 : i64, scratch_operands = 0 : i64, tpu.core_type = #tpu.core_type<tc>, window_params = [{transform_indices = @transform_0, window_bounds = array<i64: 16, 32>}, {pipeline_mode = #tpu.pipeline_mode<synchronous>, transform_indices = @transform_1, window_bounds = array<i64: 1, 32>}, {pipeline_mode = #tpu.pipeline_mode<synchronous>, transform_indices = @transform_2, window_bounds = array<i64: 1, 32>}, {transform_indices = @transform_3, window_bounds = array<i64: 16, 32>}]} {
    %c0 = arith.constant 0 : index
    %c0_0 = arith.constant 0 : index
    %0 = vector.load %arg1[%c0, %c0_0] : memref<16x32xf32, #tpu.memory_space<vmem>>, vector<16x32xf32>
    %cst = arith.constant dense<0.000000e+00> : vector<16xf32>
    %1 = vector.multi_reduction <add>, %0, %cst [1] : vector<16x32xf32> to vector<16xf32>
    %2 = vector.shape_cast %1 : vector<16xf32> to vector<16x1xf32>
    %cst_1 = arith.constant 3.200000e+01 : f32
    %3 = vector.broadcast %cst_1 : f32 to vector<16x1xf32>
    %4 = arith.divf %2, %3 : vector<16x1xf32>
    %5 = vector.broadcast %4 : vector<16x1xf32> to vector<16x32xf32>
    %6 = arith.subf %0, %5 : vector<16x32xf32>
    %7 = arith.mulf %6, %6 : vector<16x32xf32>
    %cst_2 = arith.constant dense<0.000000e+00> : vector<16xf32>
    %8 = vector.multi_reduction <add>, %7, %cst_2 [1] : vector<16x32xf32> to vector<16xf32>
    %9 = vector.shape_cast %8 : vector<16xf32> to vector<16x1xf32>
    %cst_3 = arith.constant 3.200000e+01 : f32
    %10 = vector.broadcast %cst_3 : f32 to vector<16x1xf32>
    %11 = arith.divf %9, %10 : vector<16x1xf32>
    %cst_4 = arith.constant 9.99999996E-13 : f32
    %12 = vector.broadcast %cst_4 : f32 to vector<16x1xf32>
    %13 = arith.addf %11, %12 : vector<16x1xf32>
    %14 = math.rsqrt %13 : vector<16x1xf32>
    %15 = vector.broadcast %14 : vector<16x1xf32> to vector<16x32xf32>
    %16 = arith.mulf %6, %15 : vector<16x32xf32>
    %c0_5 = arith.constant 0 : index
    %c0_6 = arith.constant 0 : index
    %17 = vector.load %arg2[%c0_5, %c0_6] : memref<1x32xf32, #tpu.memory_space<vmem>>, vector<1x32xf32>
    %18 = vector.broadcast %17 : vector<1x32xf32> to vector<16x32xf32>
    %19 = arith.mulf %16, %18 : vector<16x32xf32>
    %c0_7 = arith.constant 0 : index
    %c0_8 = arith.constant 0 : index
    %20 = vector.load %arg3[%c0_7, %c0_8] : memref<1x32xf32, #tpu.memory_space<vmem>>, vector<1x32xf32>
    %21 = vector.broadcast %20 : vector<1x32xf32> to vector<16x32xf32>
    %22 = arith.addf %19, %21 : vector<16x32xf32>
    %c0_9 = arith.constant 0 : index
    %c0_10 = arith.constant 0 : index
    %23 = vector.load %arg4[%c0_9, %c0_10] : memref<16x32xf32, #tpu.memory_space<vmem>>, vector<16x32xf32>
    tpu.vector_store %arg4[%c0_9, %c0_10], %22 {strides = array<i32>} : memref<16x32xf32, #tpu.memory_space<vmem>>, vector<16x32xf32>,
    return
  }
  func.func @transform_0(%arg0: i32) -> (i32, i32) {
    %c0_i32 = arith.constant 0 : i32
    %c0_i32_0 = arith.constant 0 : i32
    return %arg0, %c0_i32 : i32, i32
  }
  func.func @transform_1(%arg0: i32) -> (i32, i32) {
    %c0_i32 = arith.constant 0 : i32
    %c0_i32_0 = arith.constant 0 : i32
    %c0_i32_1 = arith.constant 0 : i32
    return %c0_i32, %c0_i32_0 : i32, i32
  }
  func.func @transform_2(%arg0: i32) -> (i32, i32) {
    %c0_i32 = arith.constant 0 : i32
    %c0_i32_0 = arith.constant 0 : i32
    %c0_i32_1 = arith.constant 0 : i32
    return %c0_i32, %c0_i32_0 : i32, i32
  }
  func.func @transform_3(%arg0: i32) -> (i32, i32) {
    %c0_i32 = arith.constant 0 : i32
    %c0_i32_0 = arith.constant 0 : i32
    return %arg0, %c0_i32 : i32, i32
  }
}

module attributes {stable_mosaic.version = 11 : i64} {
  func.func @_dense_kernel(%arg0: i32, %arg1: i32, %arg2: i32, %arg3: memref<16x32xf32, #tpu.memory_space<vmem>>, %arg4: memref<32x96xbf16, #tpu.memory_space<vmem>>, %arg5: memref<1x96xf32, #tpu.memory_space<vmem>>, %arg6: memref<16x96xbf16, #tpu.memory_space<vmem>>, %arg7: memref<16x96xf32, #tpu.memory_space<vmem>>) attributes {dimension_semantics = [#tpu.dimension_semantics<parallel>, #tpu.dimension_semantics<parallel>, #tpu.dimension_semantics<arbitrary>], iteration_bounds = array<i64: 1, 1, 1>, scalar_prefetch = 0 : i64, scratch_operands = 1 : i64, tpu.core_type = #tpu.core_type<tc>, window_params = [{transform_indices = @transform_0, window_bounds = array<i64: 16, 32>}, {transform_indices = @transform_1, window_bounds = array<i64: 32, 96>}, {transform_indices = @transform_2, window_bounds = array<i64: 1, 96>}, {transform_indices = @transform_3, window_bounds = array<i64: 16, 96>}]} {
    %c0_i32 = arith.constant 0 : i32
    %0 = arith.cmpi eq, %arg2, %c0_i32 : i32
    %1 = arith.extui %0 : i1 to i32
    %c0_i32_0 = arith.constant 0 : i32
    %2 = arith.cmpi ne, %1, %c0_i32_0 : i32
    scf.if %2 {
      %cst_10 = arith.constant 0.000000e+00 : f32
      %13 = vector.broadcast %cst_10 : f32 to vector<16x96xf32>
      %c0_11 = arith.constant 0 : index
      %c0_12 = arith.constant 0 : index
      %14 = vector.load %arg7[%c0_11, %c0_12] : memref<16x96xf32, #tpu.memory_space<vmem>>, vector<16x96xf32>
      tpu.vector_store %arg7[%c0_11, %c0_12], %13 {strides = array<i32>} : memref<16x96xf32, #tpu.memory_space<vmem>>, vector<16x96xf32>,
    } else {
    }
    %c0 = arith.constant 0 : index
    %c0_1 = arith.constant 0 : index
    %3 = vector.load %arg7[%c0, %c0_1] : memref<16x96xf32, #tpu.memory_space<vmem>>, vector<16x96xf32>
    %c0_2 = arith.constant 0 : index
    %c0_3 = arith.constant 0 : index
    %4 = vector.load %arg3[%c0_2, %c0_3] : memref<16x32xf32, #tpu.memory_space<vmem>>, vector<16x32xf32>
    %5 = arith.truncf %4 : vector<16x32xf32> to vector<16x32xbf16>
    %c0_4 = arith.constant 0 : index
    %c0_5 = arith.constant 0 : index
    %6 = vector.load %arg4[%c0_4, %c0_5] : memref<32x96xbf16, #tpu.memory_space<vmem>>, vector<32x96xbf16>
    %cst = arith.constant dense<0.000000e+00> : vector<16x96xf32>
    %7 = tpu.matmul %5, %6, %cst {dimension_numbers = #tpu.dot_dimension_numbers<[1], [0], [0], [1], [0, 0, 1, 1], [], []>} : vector<16x32xbf16>, vector<32x96xbf16>, vector<16x96xf32> -> vector<16x96xf32>
    %8 = arith.addf %3, %7 : vector<16x96xf32>
    %c0_6 = arith.constant 0 : index
    %c0_7 = arith.constant 0 : index
    %9 = vector.load %arg7[%c0_6, %c0_7] : memref<16x96xf32, #tpu.memory_space<vmem>>, vector<16x96xf32>
    tpu.vector_store %arg7[%c0_6, %c0_7], %8 {strides = array<i32>} : memref<16x96xf32, #tpu.memory_space<vmem>>, vector<16x96xf32>,
    %c0_i32_8 = arith.constant 0 : i32
    %10 = arith.cmpi eq, %arg2, %c0_i32_8 : i32
    %11 = arith.extui %10 : i1 to i32
    %c0_i32_9 = arith.constant 0 : i32
    %12 = arith.cmpi ne, %11, %c0_i32_9 : i32
    scf.if %12 {
      %c0_10 = arith.constant 0 : index
      %c0_11 = arith.constant 0 : index
      %13 = vector.load %arg7[%c0_10, %c0_11] : memref<16x96xf32, #tpu.memory_space<vmem>>, vector<16x96xf32>
      %c0_12 = arith.constant 0 : index
      %c0_13 = arith.constant 0 : index
      %14 = vector.load %arg5[%c0_12, %c0_13] : memref<1x96xf32, #tpu.memory_space<vmem>>, vector<1x96xf32>
      %15 = vector.broadcast %14 : vector<1x96xf32> to vector<16x96xf32>
      %16 = arith.addf %13, %15 : vector<16x96xf32>
      %17 = arith.truncf %16 : vector<16x96xf32> to vector<16x96xbf16>
      %c0_14 = arith.constant 0 : index
      %c0_15 = arith.constant 0 : index
      %18 = vector.load %arg6[%c0_14, %c0_15] : memref<16x96xbf16, #tpu.memory_space<vmem>>, vector<16x96xbf16>
      tpu.vector_store %arg6[%c0_14, %c0_15], %17 {strides = array<i32>} : memref<16x96xbf16, #tpu.memory_space<vmem>>, vector<16x96xbf16>,
    } else {
    }
    return
  }
  func.func @transform_0(%arg0: i32, %arg1: i32, %arg2: i32) -> (i32, i32) {
    %c0_i32 = arith.constant 0 : i32
    return %arg0, %arg2 : i32, i32
  }
  func.func @transform_1(%arg0: i32, %arg1: i32, %arg2: i32) -> (i32, i32) {
    %c0_i32 = arith.constant 0 : i32
    return %arg2, %arg1 : i32, i32
  }
  func.func @transform_2(%arg0: i32, %arg1: i32, %arg2: i32) -> (i32, i32) {
    %c0_i32 = arith.constant 0 : i32
    %c0_i32_0 = arith.constant 0 : i32
    return %c0_i32, %arg1 : i32, i32
  }
  func.func @transform_3(%arg0: i32, %arg1: i32, %arg2: i32) -> (i32, i32) {
    %c0_i32 = arith.constant 0 : i32
    return %arg0, %arg1 : i32, i32
  }
}

module attributes {stable_mosaic.version = 11 : i64} {
  func.func @_attn_kernel(%arg0: i32, %arg1: memref<1x8x96xbf16, #tpu.memory_space<vmem>>, %arg2: memref<1x1x8xf32, #tpu.memory_space<vmem>>, %arg3: memref<1x8x32xbf16, #tpu.memory_space<vmem>>, %arg4: memref<8x32xf32, #tpu.memory_space<vmem>>) attributes {dimension_semantics = [#tpu.dimension_semantics<parallel>], iteration_bounds = array<i64: 2>, scalar_prefetch = 0 : i64, scratch_operands = 1 : i64, tpu.core_type = #tpu.core_type<tc>, window_params = [{transform_indices = @transform_0, window_bounds = array<i64: 1, 8, 96>}, {transform_indices = @transform_1, window_bounds = array<i64: 1, 1, 8>}, {transform_indices = @transform_2, window_bounds = array<i64: 1, 8, 32>}]} {
    %c0 = arith.constant 0 : index
    %c0_0 = arith.constant 0 : index
    %c0_1 = arith.constant 0 : index
    %0 = vector.load %arg1[%c0, %c0_0, %c0_1] : memref<1x8x96xbf16, #tpu.memory_space<vmem>>, vector<1x8x32xbf16>
    %1 = vector.shape_cast %0 : vector<1x8x32xbf16> to vector<8x32xbf16>
    %2 = arith.extf %1 : vector<8x32xbf16> to vector<8x32xf32>
    %cst = arith.constant 0.353553385 : f32
    %3 = vector.broadcast %cst : f32 to vector<8x32xf32>
    %4 = arith.mulf %2, %3 : vector<8x32xf32>
    %5 = arith.truncf %4 : vector<8x32xf32> to vector<8x32xbf16>
    %c0_2 = arith.constant 0 : index
    %c0_3 = arith.constant 0 : index
    %c0_4 = arith.constant 0 : index
    %6 = vector.load %arg2[%c0_2, %c0_3, %c0_4] : memref<1x1x8xf32, #tpu.memory_space<vmem>>, vector<1x1x8xf32>
    %7 = vector.shape_cast %6 : vector<1x1x8xf32> to vector<1x8xf32>
    %8 = vector.shape_cast %7 : vector<1x8xf32> to vector<1x8xf32>
    %9 = vector.broadcast %8 : vector<1x8xf32> to vector<8x8xf32>
    %10 = vector.extract_strided_slice %5 {offsets = [0, 0], sizes = [8, 8], strides = [1, 1]} : vector<8x32xbf16> to vector<8x8xbf16>
    %c0_5 = arith.constant 0 : index
    %c0_6 = arith.constant 0 : index
    %c32 = arith.constant 32 : index
    %11 = vector.load %arg1[%c0_5, %c0_6, %c32] : memref<1x8x96xbf16, #tpu.memory_space<vmem>>, vector<1x8x8xbf16>
    %12 = vector.shape_cast %11 : vector<1x8x8xbf16> to vector<8x8xbf16>
    %c0_7 = arith.constant 0 : index
    %c0_8 = arith.constant 0 : index
    %c64 = arith.constant 64 : index
    %13 = vector.load %arg1[%c0_7, %c0_8, %c64] : memref<1x8x96xbf16, #tpu.memory_space<vmem>>, vector<1x8x8xbf16>
    %14 = vector.shape_cast %13 : vector<1x8x8xbf16> to vector<8x8xbf16>
    %cst_9 = arith.constant dense<0.000000e+00> : vector<8x8xf32>
    %15 = tpu.matmul %10, %12, %cst_9 {dimension_numbers = #tpu.dot_dimension_numbers<[1], [1], [0], [0], [0, 0, 1, 0], [], []>} : vector<8x8xbf16>, vector<8x8xbf16>, vector<8x8xf32> -> vector<8x8xf32>
    %16 = arith.addf %15, %9 : vector<8x8xf32>
    %cst_10 = arith.constant dense<0xFF800000> : vector<8xf32>
    %17 = vector.multi_reduction <maximumf>, %16, %cst_10 [1] : vector<8x8xf32> to vector<8xf32>
    %18 = vector.shape_cast %17 : vector<8xf32> to vector<8x1xf32>
    %19 = vector.broadcast %18 : vector<8x1xf32> to vector<8x8xf32>
    %20 = arith.subf %16, %19 : vector<8x8xf32>
    %21 = math.exp %20 : vector<8x8xf32>
    %cst_11 = arith.constant dense<0.000000e+00> : vector<8xf32>
    %22 = vector.multi_reduction <add>, %21, %cst_11 [1] : vector<8x8xf32> to vector<8xf32>
    %23 = vector.shape_cast %22 : vector<8xf32> to vector<8x1xf32>
    %24 = tpu.reciprocal %23 {approx = true} : vector<8x1xf32> -> vector<8x1xf32>
    %25 = vector.broadcast %24 : vector<8x1xf32> to vector<8x8xf32>
    %26 = arith.mulf %21, %25 : vector<8x8xf32>
    %27 = arith.truncf %26 : vector<8x8xf32> to vector<8x8xbf16>
    %cst_12 = arith.constant dense<0.000000e+00> : vector<8x8xf32>
    %28 = tpu.matmul %27, %14, %cst_12 {dimension_numbers = #tpu.dot_dimension_numbers<[1], [0], [0], [1], [0, 0, 1, 1], [], []>} : vector<8x8xbf16>, vector<8x8xbf16>, vector<8x8xf32> -> vector<8x8xf32>
    %c0_13 = arith.constant 0 : index
    %c0_14 = arith.constant 0 : index
    %29 = vector.load %arg4[%c0_13, %c0_14] : memref<8x32xf32, #tpu.memory_space<vmem>>, vector<8x8xf32>
    tpu.vector_store %arg4[%c0_13, %c0_14], %28 {strides = array<i32>} : memref<8x32xf32, #tpu.memory_space<vmem>>, vector<8x8xf32>,
    %30 = vector.extract_strided_slice %5 {offsets = [0, 8], sizes = [8, 8], strides = [1, 1]} : vector<8x32xbf16> to vector<8x8xbf16>
    %c0_15 = arith.constant 0 : index
    %c0_16 = arith.constant 0 : index
    %c40 = arith.constant 40 : index
    %31 = vector.load %arg1[%c0_15, %c0_16, %c40] : memref<1x8x96xbf16, #tpu.memory_space<vmem>>, vector<1x8x8xbf16>
    %32 = vector.shape_cast %31 : vector<1x8x8xbf16> to vector<8x8xbf16>
    %c0_17 = arith.constant 0 : index
    %c0_18 = arith.constant 0 : index
    %c72 = arith.constant 72 : index
    %33 = vector.load %arg1[%c0_17, %c0_18, %c72] : memref<1x8x96xbf16, #tpu.memory_space<vmem>>, vector<1x8x8xbf16>
    %34 = vector.shape_cast %33 : vector<1x8x8xbf16> to vector<8x8xbf16>
    %cst_19 = arith.constant dense<0.000000e+00> : vector<8x8xf32>
    %35 = tpu.matmul %30, %32, %cst_19 {dimension_numbers = #tpu.dot_dimension_numbers<[1], [1], [0], [0], [0, 0, 1, 0], [], []>} : vector<8x8xbf16>, vector<8x8xbf16>, vector<8x8xf32> -> vector<8x8xf32>
    %36 = arith.addf %35, %9 : vector<8x8xf32>
    %cst_20 = arith.constant dense<0xFF800000> : vector<8xf32>
    %37 = vector.multi_reduction <maximumf>, %36, %cst_20 [1] : vector<8x8xf32> to vector<8xf32>
    %38 = vector.shape_cast %37 : vector<8xf32> to vector<8x1xf32>
    %39 = vector.broadcast %38 : vector<8x1xf32> to vector<8x8xf32>
    %40 = arith.subf %36, %39 : vector<8x8xf32>
    %41 = math.exp %40 : vector<8x8xf32>
    %cst_21 = arith.constant dense<0.000000e+00> : vector<8xf32>
    %42 = vector.multi_reduction <add>, %41, %cst_21 [1] : vector<8x8xf32> to vector<8xf32>
    %43 = vector.shape_cast %42 : vector<8xf32> to vector<8x1xf32>
    %44 = tpu.reciprocal %43 {approx = true} : vector<8x1xf32> -> vector<8x1xf32>
    %45 = vector.broadcast %44 : vector<8x1xf32> to vector<8x8xf32>
    %46 = arith.mulf %41, %45 : vector<8x8xf32>
    %47 = arith.truncf %46 : vector<8x8xf32> to vector<8x8xbf16>
    %cst_22 = arith.constant dense<0.000000e+00> : vector<8x8xf32>
    %48 = tpu.matmul %47, %34, %cst_22 {dimension_numbers = #tpu.dot_dimension_numbers<[1], [0], [0], [1], [0, 0, 1, 1], [], []>} : vector<8x8xbf16>, vector<8x8xbf16>, vector<8x8xf32> -> vector<8x8xf32>
    %c0_23 = arith.constant 0 : index
    %c8 = arith.constant 8 : index
    %49 = vector.load %arg4[%c0_23, %c8] : memref<8x32xf32, #tpu.memory_space<vmem>>, vector<8x8xf32>
    tpu.vector_store %arg4[%c0_23, %c8], %48 {strides = array<i32>} : memref<8x32xf32, #tpu.memory_space<vmem>>, vector<8x8xf32>,
    %50 = vector.extract_strided_slice %5 {offsets = [0, 16], sizes = [8, 8], strides = [1, 1]} : vector<8x32xbf16> to vector<8x8xbf16>
    %c0_24 = arith.constant 0 : index
    %c0_25 = arith.constant 0 : index
    %c48 = arith.constant 48 : index
    %51 = vector.load %arg1[%c0_24, %c0_25, %c48] : memref<1x8x96xbf16, #tpu.memory_space<vmem>>, vector<1x8x8xbf16>
    %52 = vector.shape_cast %51 : vector<1x8x8xbf16> to vector<8x8xbf16>
    %c0_26 = arith.constant 0 : index
    %c0_27 = arith.constant 0 : index
    %c80 = arith.constant 80 : index
    %53 = vector.load %arg1[%c0_26, %c0_27, %c80] : memref<1x8x96xbf16, #tpu.memory_space<vmem>>, vector<1x8x8xbf16>
    %54 = vector.shape_cast %53 : vector<1x8x8xbf16> to vector<8x8xbf16>
    %cst_28 = arith.constant dense<0.000000e+00> : vector<8x8xf32>
    %55 = tpu.matmul %50, %52, %cst_28 {dimension_numbers = #tpu.dot_dimension_numbers<[1], [1], [0], [0], [0, 0, 1, 0], [], []>} : vector<8x8xbf16>, vector<8x8xbf16>, vector<8x8xf32> -> vector<8x8xf32>
    %56 = arith.addf %55, %9 : vector<8x8xf32>
    %cst_29 = arith.constant dense<0xFF800000> : vector<8xf32>
    %57 = vector.multi_reduction <maximumf>, %56, %cst_29 [1] : vector<8x8xf32> to vector<8xf32>
    %58 = vector.shape_cast %57 : vector<8xf32> to vector<8x1xf32>
    %59 = vector.broadcast %58 : vector<8x1xf32> to vector<8x8xf32>
    %60 = arith.subf %56, %59 : vector<8x8xf32>
    %61 = math.exp %60 : vector<8x8xf32>
    %cst_30 = arith.constant dense<0.000000e+00> : vector<8xf32>
    %62 = vector.multi_reduction <add>, %61, %cst_30 [1] : vector<8x8xf32> to vector<8xf32>
    %63 = vector.shape_cast %62 : vector<8xf32> to vector<8x1xf32>
    %64 = tpu.reciprocal %63 {approx = true} : vector<8x1xf32> -> vector<8x1xf32>
    %65 = vector.broadcast %64 : vector<8x1xf32> to vector<8x8xf32>
    %66 = arith.mulf %61, %65 : vector<8x8xf32>
    %67 = arith.truncf %66 : vector<8x8xf32> to vector<8x8xbf16>
    %cst_31 = arith.constant dense<0.000000e+00> : vector<8x8xf32>
    %68 = tpu.matmul %67, %54, %cst_31 {dimension_numbers = #tpu.dot_dimension_numbers<[1], [0], [0], [1], [0, 0, 1, 1], [], []>} : vector<8x8xbf16>, vector<8x8xbf16>, vector<8x8xf32> -> vector<8x8xf32>
    %c0_32 = arith.constant 0 : index
    %c16 = arith.constant 16 : index
    %69 = vector.load %arg4[%c0_32, %c16] : memref<8x32xf32, #tpu.memory_space<vmem>>, vector<8x8xf32>
    tpu.vector_store %arg4[%c0_32, %c16], %68 {strides = array<i32>} : memref<8x32xf32, #tpu.memory_space<vmem>>, vector<8x8xf32>,
    %70 = vector.extract_strided_slice %5 {offsets = [0, 24], sizes = [8, 8], strides = [1, 1]} : vector<8x32xbf16> to vector<8x8xbf16>
    %c0_33 = arith.constant 0 : index
    %c0_34 = arith.constant 0 : index
    %c56 = arith.constant 56 : index
    %71 = vector.load %arg1[%c0_33, %c0_34, %c56] : memref<1x8x96xbf16, #tpu.memory_space<vmem>>, vector<1x8x8xbf16>
    %72 = vector.shape_cast %71 : vector<1x8x8xbf16> to vector<8x8xbf16>
    %c0_35 = arith.constant 0 : index
    %c0_36 = arith.constant 0 : index
    %c88 = arith.constant 88 : index
    %73 = vector.load %arg1[%c0_35, %c0_36, %c88] : memref<1x8x96xbf16, #tpu.memory_space<vmem>>, vector<1x8x8xbf16>
    %74 = vector.shape_cast %73 : vector<1x8x8xbf16> to vector<8x8xbf16>
    %cst_37 = arith.constant dense<0.000000e+00> : vector<8x8xf32>
    %75 = tpu.matmul %70, %72, %cst_37 {dimension_numbers = #tpu.dot_dimension_numbers<[1], [1], [0], [0], [0, 0, 1, 0], [], []>} : vector<8x8xbf16>, vector<8x8xbf16>, vector<8x8xf32> -> vector<8x8xf32>
    %76 = arith.addf %75, %9 : vector<8x8xf32>
    %cst_38 = arith.constant dense<0xFF800000> : vector<8xf32>
    %77 = vector.multi_reduction <maximumf>, %76, %cst_38 [1] : vector<8x8xf32> to vector<8xf32>
    %78 = vector.shape_cast %77 : vector<8xf32> to vector<8x1xf32>
    %79 = vector.broadcast %78 : vector<8x1xf32> to vector<8x8xf32>
    %80 = arith.subf %76, %79 : vector<8x8xf32>
    %81 = math.exp %80 : vector<8x8xf32>
    %cst_39 = arith.constant dense<0.000000e+00> : vector<8xf32>
    %82 = vector.multi_reduction <add>, %81, %cst_39 [1] : vector<8x8xf32> to vector<8xf32>
    %83 = vector.shape_cast %82 : vector<8xf32> to vector<8x1xf32>
    %84 = tpu.reciprocal %83 {approx = true} : vector<8x1xf32> -> vector<8x1xf32>
    %85 = vector.broadcast %84 : vector<8x1xf32> to vector<8x8xf32>
    %86 = arith.mulf %81, %85 : vector<8x8xf32>
    %87 = arith.truncf %86 : vector<8x8xf32> to vector<8x8xbf16>
    %cst_40 = arith.constant dense<0.000000e+00> : vector<8x8xf32>
    %88 = tpu.matmul %87, %74, %cst_40 {dimension_numbers = #tpu.dot_dimension_numbers<[1], [0], [0], [1], [0, 0, 1, 1], [], []>} : vector<8x8xbf16>, vector<8x8xbf16>, vector<8x8xf32> -> vector<8x8xf32>
    %c0_41 = arith.constant 0 : index
    %c24 = arith.constant 24 : index
    %89 = vector.load %arg4[%c0_41, %c24] : memref<8x32xf32, #tpu.memory_space<vmem>>, vector<8x8xf32>
    tpu.vector_store %arg4[%c0_41, %c24], %88 {strides = array<i32>} : memref<8x32xf32, #tpu.memory_space<vmem>>, vector<8x8xf32>,
    %c0_42 = arith.constant 0 : index
    %c0_43 = arith.constant 0 : index
    %90 = vector.load %arg4[%c0_42, %c0_43] : memref<8x32xf32, #tpu.memory_space<vmem>>, vector<8x32xf32>
    %91 = arith.truncf %90 : vector<8x32xf32> to vector<8x32xbf16>
    %c0_44 = arith.constant 0 : index
    %c0_45 = arith.constant 0 : index
    %c0_46 = arith.constant 0 : index
    %92 = vector.load %arg3[%c0_44, %c0_45, %c0_46] : memref<1x8x32xbf16, #tpu.memory_space<vmem>>, vector<1x8x32xbf16>
    %93 = vector.shape_cast %92 : vector<1x8x32xbf16> to vector<8x32xbf16>
    %94 = vector.shape_cast %91 : vector<8x32xbf16> to vector<1x8x32xbf16>
    tpu.vector_store %arg3[%c0_44, %c0_45, %c0_46], %94 {strides = array<i32>} : memref<1x8x32xbf16, #tpu.memory_space<vmem>>, vector<1x8x32xbf16>,
    return
  }
  func.func @transform_0(%arg0: i32) -> (i32, i32, i32) {
    %c0_i32 = arith.constant 0 : i32
    %c0_i32_0 = arith.constant 0 : i32
    %c0_i32_1 = arith.constant 0 : i32
    return %arg0, %c0_i32, %c0_i32_0 : i32, i32, i32
  }
  func.func @transform_1(%arg0: i32) -> (i32, i32, i32) {
    %c0_i32 = arith.constant 0 : i32
    %c0_i32_0 = arith.constant 0 : i32
    %c0_i32_1 = arith.constant 0 : i32
    return %arg0, %c0_i32, %c0_i32_0 : i32, i32, i32
  }
  func.func @transform_2(%arg0: i32) -> (i32, i32, i32) {
    %c0_i32 = arith.constant 0 : i32
    %c0_i32_0 = arith.constant 0 : i32
    %c0_i32_1 = arith.constant 0 : i32
    return %arg0, %c0_i32, %c0_i32_0 : i32, i32, i32
  }
}

module attributes {stable_mosaic.version = 11 : i64} {
  func.func @_dense_res_ln_kernel(%arg0: i32, %arg1: i32, %arg2: memref<16x32xbf16, #tpu.memory_space<vmem>>, %arg3: memref<32x32xbf16, #tpu.memory_space<vmem>>, %arg4: memref<1x32xf32, #tpu.memory_space<vmem>>, %arg5: memref<16x32xf32, #tpu.memory_space<vmem>>, %arg6: memref<1x32xf32, #tpu.memory_space<vmem>>, %arg7: memref<1x32xf32, #tpu.memory_space<vmem>>, %arg8: memref<16x32xf32, #tpu.memory_space<vmem>>) attributes {dimension_semantics = [#tpu.dimension_semantics<parallel>, #tpu.dimension_semantics<arbitrary>], iteration_bounds = array<i64: 1, 1>, scalar_prefetch = 0 : i64, scratch_operands = 0 : i64, tpu.core_type = #tpu.core_type<tc>, window_params = [{transform_indices = @transform_0, window_bounds = array<i64: 16, 32>}, {transform_indices = @transform_1, window_bounds = array<i64: 32, 32>}, {pipeline_mode = #tpu.pipeline_mode<synchronous>, transform_indices = @transform_2, window_bounds = array<i64: 1, 32>}, {transform_indices = @transform_3, window_bounds = array<i64: 16, 32>}, {pipeline_mode = #tpu.pipeline_mode<synchronous>, transform_indices = @transform_4, window_bounds = array<i64: 1, 32>}, {pipeline_mode = #tpu.pipeline_mode<synchronous>, transform_indices = @transform_5, window_bounds = array<i64: 1, 32>}, {transform_indices = @transform_6, window_bounds = array<i64: 16, 32>}]} {
    %c0_i32 = arith.constant 0 : i32
    %0 = arith.cmpi eq, %arg1, %c0_i32 : i32
    %1 = arith.extui %0 : i1 to i32
    %c0_i32_0 = arith.constant 0 : i32
    %2 = arith.cmpi ne, %1, %c0_i32_0 : i32
    scf.if %2 {
      %cst_10 = arith.constant 0.000000e+00 : f32
      %12 = vector.broadcast %cst_10 : f32 to vector<16x32xf32>
      %c0_11 = arith.constant 0 : index
      %c0_12 = arith.constant 0 : index
      %13 = vector.load %arg8[%c0_11, %c0_12] : memref<16x32xf32, #tpu.memory_space<vmem>>, vector<16x32xf32>
      tpu.vector_store %arg8[%c0_11, %c0_12], %12 {strides = array<i32>} : memref<16x32xf32, #tpu.memory_space<vmem>>, vector<16x32xf32>,
    } else {
    }
    %c0 = arith.constant 0 : index
    %c0_1 = arith.constant 0 : index
    %3 = vector.load %arg8[%c0, %c0_1] : memref<16x32xf32, #tpu.memory_space<vmem>>, vector<16x32xf32>
    %c0_2 = arith.constant 0 : index
    %c0_3 = arith.constant 0 : index
    %4 = vector.load %arg2[%c0_2, %c0_3] : memref<16x32xbf16, #tpu.memory_space<vmem>>, vector<16x32xbf16>
    %c0_4 = arith.constant 0 : index
    %c0_5 = arith.constant 0 : index
    %5 = vector.load %arg3[%c0_4, %c0_5] : memref<32x32xbf16, #tpu.memory_space<vmem>>, vector<32x32xbf16>
    %cst = arith.constant dense<0.000000e+00> : vector<16x32xf32>
    %6 = tpu.matmul %4, %5, %cst {dimension_numbers = #tpu.dot_dimension_numbers<[1], [0], [0], [1], [0, 0, 1, 1], [], []>} : vector<16x32xbf16>, vector<32x32xbf16>, vector<16x32xf32> -> vector<16x32xf32>
    %7 = arith.addf %3, %6 : vector<16x32xf32>
    %c0_6 = arith.constant 0 : index
    %c0_7 = arith.constant 0 : index
    %8 = vector.load %arg8[%c0_6, %c0_7] : memref<16x32xf32, #tpu.memory_space<vmem>>, vector<16x32xf32>
    tpu.vector_store %arg8[%c0_6, %c0_7], %7 {strides = array<i32>} : memref<16x32xf32, #tpu.memory_space<vmem>>, vector<16x32xf32>,
    %c0_i32_8 = arith.constant 0 : i32
    %9 = arith.cmpi eq, %arg1, %c0_i32_8 : i32
    %10 = arith.extui %9 : i1 to i32
    %c0_i32_9 = arith.constant 0 : i32
    %11 = arith.cmpi ne, %10, %c0_i32_9 : i32
    scf.if %11 {
      %c0_10 = arith.constant 0 : index
      %c0_11 = arith.constant 0 : index
      %12 = vector.load %arg8[%c0_10, %c0_11] : memref<16x32xf32, #tpu.memory_space<vmem>>, vector<16x32xf32>
      %c0_12 = arith.constant 0 : index
      %c0_13 = arith.constant 0 : index
      %13 = vector.load %arg4[%c0_12, %c0_13] : memref<1x32xf32, #tpu.memory_space<vmem>>, vector<1x32xf32>
      %14 = vector.broadcast %13 : vector<1x32xf32> to vector<16x32xf32>
      %15 = arith.addf %12, %14 : vector<16x32xf32>
      %c0_14 = arith.constant 0 : index
      %c0_15 = arith.constant 0 : index
      %16 = vector.load %arg5[%c0_14, %c0_15] : memref<16x32xf32, #tpu.memory_space<vmem>>, vector<16x32xf32>
      %17 = arith.addf %15, %16 : vector<16x32xf32>
      %cst_16 = arith.constant dense<0.000000e+00> : vector<16xf32>
      %18 = vector.multi_reduction <add>, %17, %cst_16 [1] : vector<16x32xf32> to vector<16xf32>
      %19 = vector.shape_cast %18 : vector<16xf32> to vector<16x1xf32>
      %cst_17 = arith.constant 3.200000e+01 : f32
      %20 = vector.broadcast %cst_17 : f32 to vector<16x1xf32>
      %21 = arith.divf %19, %20 : vector<16x1xf32>
      %22 = vector.broadcast %21 : vector<16x1xf32> to vector<16x32xf32>
      %23 = arith.subf %17, %22 : vector<16x32xf32>
      %24 = arith.mulf %23, %23 : vector<16x32xf32>
      %cst_18 = arith.constant dense<0.000000e+00> : vector<16xf32>
      %25 = vector.multi_reduction <add>, %24, %cst_18 [1] : vector<16x32xf32> to vector<16xf32>
      %26 = vector.shape_cast %25 : vector<16xf32> to vector<16x1xf32>
      %cst_19 = arith.constant 3.200000e+01 : f32
      %27 = vector.broadcast %cst_19 : f32 to vector<16x1xf32>
      %28 = arith.divf %26, %27 : vector<16x1xf32>
      %cst_20 = arith.constant 9.99999996E-13 : f32
      %29 = vector.broadcast %cst_20 : f32 to vector<16x1xf32>
      %30 = arith.addf %28, %29 : vector<16x1xf32>
      %31 = math.rsqrt %30 : vector<16x1xf32>
      %32 = vector.broadcast %31 : vector<16x1xf32> to vector<16x32xf32>
      %33 = arith.mulf %23, %32 : vector<16x32xf32>
      %c0_21 = arith.constant 0 : index
      %c0_22 = arith.constant 0 : index
      %34 = vector.load %arg6[%c0_21, %c0_22] : memref<1x32xf32, #tpu.memory_space<vmem>>, vector<1x32xf32>
      %35 = vector.broadcast %34 : vector<1x32xf32> to vector<16x32xf32>
      %36 = arith.mulf %33, %35 : vector<16x32xf32>
      %c0_23 = arith.constant 0 : index
      %c0_24 = arith.constant 0 : index
      %37 = vector.load %arg7[%c0_23, %c0_24] : memref<1x32xf32, #tpu.memory_space<vmem>>, vector<1x32xf32>
      %38 = vector.broadcast %37 : vector<1x32xf32> to vector<16x32xf32>
      %39 = arith.addf %36, %38 : vector<16x32xf32>
      %c0_25 = arith.constant 0 : index
      %c0_26 = arith.constant 0 : index
      %40 = vector.load %arg8[%c0_25, %c0_26] : memref<16x32xf32, #tpu.memory_space<vmem>>, vector<16x32xf32>
      tpu.vector_store %arg8[%c0_25, %c0_26], %39 {strides = array<i32>} : memref<16x32xf32, #tpu.memory_space<vmem>>, vector<16x32xf32>,
    } else {
    }
    return
  }
  func.func @transform_0(%arg0: i32, %arg1: i32) -> (i32, i32) {
    %c0_i32 = arith.constant 0 : i32
    return %arg0, %arg1 : i32, i32
  }
  func.func @transform_1(%arg0: i32, %arg1: i32) -> (i32, i32) {
    %c0_i32 = arith.constant 0 : i32
    %c0_i32_0 = arith.constant 0 : i32
    return %arg1, %c0_i32 : i32, i32
  }
  func.func @transform_2(%arg0: i32, %arg1: i32) -> (i32, i32) {
    %c0_i32 = arith.constant 0 : i32
    %c0_i32_0 = arith.constant 0 : i32
    %c0_i32_1 = arith.constant 0 : i32
    return %c0_i32, %c0_i32_0 : i32, i32
  }
  func.func @transform_3(%arg0: i32, %arg1: i32) -> (i32, i32) {
    %c0_i32 = arith.constant 0 : i32
    %c0_i32_0 = arith.constant 0 : i32
    return %arg0, %c0_i32 : i32, i32
  }
  func.func @transform_4(%arg0: i32, %arg1: i32) -> (i32, i32) {
    %c0_i32 = arith.constant 0 : i32
    %c0_i32_0 = arith.constant 0 : i32
    %c0_i32_1 = arith.constant 0 : i32
    return %c0_i32, %c0_i32_0 : i32, i32
  }
  func.func @transform_5(%arg0: i32, %arg1: i32) -> (i32, i32) {
    %c0_i32 = arith.constant 0 : i32
    %c0_i32_0 = arith.constant 0 : i32
    %c0_i32_1 = arith.constant 0 : i32
    return %c0_i32, %c0_i32_0 : i32, i32
  }
  func.func @transform_6(%arg0: i32, %arg1: i32) -> (i32, i32) {
    %c0_i32 = arith.constant 0 : i32
    %c0_i32_0 = arith.constant 0 : i32
    return %arg0, %c0_i32 : i32, i32
  }
}

module attributes {stable_mosaic.version = 11 : i64} {
  func.func @_dense_kernel(%arg0: i32, %arg1: i32, %arg2: i32, %arg3: memref<16x32xf32, #tpu.memory_space<vmem>>, %arg4: memref<32x64xbf16, #tpu.memory_space<vmem>>, %arg5: memref<1x64xf32, #tpu.memory_space<vmem>>, %arg6: memref<16x64xbf16, #tpu.memory_space<vmem>>, %arg7: memref<16x64xf32, #tpu.memory_space<vmem>>) attributes {dimension_semantics = [#tpu.dimension_semantics<parallel>, #tpu.dimension_semantics<parallel>, #tpu.dimension_semantics<arbitrary>], iteration_bounds = array<i64: 1, 1, 1>, scalar_prefetch = 0 : i64, scratch_operands = 1 : i64, tpu.core_type = #tpu.core_type<tc>, window_params = [{transform_indices = @transform_0, window_bounds = array<i64: 16, 32>}, {transform_indices = @transform_1, window_bounds = array<i64: 32, 64>}, {transform_indices = @transform_2, window_bounds = array<i64: 1, 64>}, {transform_indices = @transform_3, window_bounds = array<i64: 16, 64>}]} {
    %c0_i32 = arith.constant 0 : i32
    %0 = arith.cmpi eq, %arg2, %c0_i32 : i32
    %1 = arith.extui %0 : i1 to i32
    %c0_i32_0 = arith.constant 0 : i32
    %2 = arith.cmpi ne, %1, %c0_i32_0 : i32
    scf.if %2 {
      %cst_10 = arith.constant 0.000000e+00 : f32
      %13 = vector.broadcast %cst_10 : f32 to vector<16x64xf32>
      %c0_11 = arith.constant 0 : index
      %c0_12 = arith.constant 0 : index
      %14 = vector.load %arg7[%c0_11, %c0_12] : memref<16x64xf32, #tpu.memory_space<vmem>>, vector<16x64xf32>
      tpu.vector_store %arg7[%c0_11, %c0_12], %13 {strides = array<i32>} : memref<16x64xf32, #tpu.memory_space<vmem>>, vector<16x64xf32>,
    } else {
    }
    %c0 = arith.constant 0 : index
    %c0_1 = arith.constant 0 : index
    %3 = vector.load %arg7[%c0, %c0_1] : memref<16x64xf32, #tpu.memory_space<vmem>>, vector<16x64xf32>
    %c0_2 = arith.constant 0 : index
    %c0_3 = arith.constant 0 : index
    %4 = vector.load %arg3[%c0_2, %c0_3] : memref<16x32xf32, #tpu.memory_space<vmem>>, vector<16x32xf32>
    %5 = arith.truncf %4 : vector<16x32xf32> to vector<16x32xbf16>
    %c0_4 = arith.constant 0 : index
    %c0_5 = arith.constant 0 : index
    %6 = vector.load %arg4[%c0_4, %c0_5] : memref<32x64xbf16, #tpu.memory_space<vmem>>, vector<32x64xbf16>
    %cst = arith.constant dense<0.000000e+00> : vector<16x64xf32>
    %7 = tpu.matmul %5, %6, %cst {dimension_numbers = #tpu.dot_dimension_numbers<[1], [0], [0], [1], [0, 0, 1, 1], [], []>} : vector<16x32xbf16>, vector<32x64xbf16>, vector<16x64xf32> -> vector<16x64xf32>
    %8 = arith.addf %3, %7 : vector<16x64xf32>
    %c0_6 = arith.constant 0 : index
    %c0_7 = arith.constant 0 : index
    %9 = vector.load %arg7[%c0_6, %c0_7] : memref<16x64xf32, #tpu.memory_space<vmem>>, vector<16x64xf32>
    tpu.vector_store %arg7[%c0_6, %c0_7], %8 {strides = array<i32>} : memref<16x64xf32, #tpu.memory_space<vmem>>, vector<16x64xf32>,
    %c0_i32_8 = arith.constant 0 : i32
    %10 = arith.cmpi eq, %arg2, %c0_i32_8 : i32
    %11 = arith.extui %10 : i1 to i32
    %c0_i32_9 = arith.constant 0 : i32
    %12 = arith.cmpi ne, %11, %c0_i32_9 : i32
    scf.if %12 {
      %c0_10 = arith.constant 0 : index
      %c0_11 = arith.constant 0 : index
      %13 = vector.load %arg7[%c0_10, %c0_11] : memref<16x64xf32, #tpu.memory_space<vmem>>, vector<16x64xf32>
      %c0_12 = arith.constant 0 : index
      %c0_13 = arith.constant 0 : index
      %14 = vector.load %arg5[%c0_12, %c0_13] : memref<1x64xf32, #tpu.memory_space<vmem>>, vector<1x64xf32>
      %15 = vector.broadcast %14 : vector<1x64xf32> to vector<16x64xf32>
      %16 = arith.addf %13, %15 : vector<16x64xf32>
      %cst_14 = arith.constant 5.000000e-01 : f32
      %17 = vector.broadcast %cst_14 : f32 to vector<16x64xf32>
      %18 = arith.mulf %17, %16 : vector<16x64xf32>
      %cst_15 = arith.constant 4.471500e-02 : f32
      %19 = vector.broadcast %cst_15 : f32 to vector<16x64xf32>
      %20 = arith.mulf %19, %16 : vector<16x64xf32>
      %21 = arith.mulf %20, %16 : vector<16x64xf32>
      %22 = arith.mulf %21, %16 : vector<16x64xf32>
      %23 = arith.addf %16, %22 : vector<16x64xf32>
      %cst_16 = arith.constant 0.797884583 : f32
      %24 = vector.broadcast %cst_16 : f32 to vector<16x64xf32>
      %25 = arith.mulf %24, %23 : vector<16x64xf32>
      %26 = math.tanh %25 : vector<16x64xf32>
      %cst_17 = arith.constant 1.000000e+00 : f32
      %27 = vector.broadcast %cst_17 : f32 to vector<16x64xf32>
      %28 = arith.addf %27, %26 : vector<16x64xf32>
      %29 = arith.mulf %18, %28 : vector<16x64xf32>
      %30 = arith.truncf %29 : vector<16x64xf32> to vector<16x64xbf16>
      %c0_18 = arith.constant 0 : index
      %c0_19 = arith.constant 0 : index
      %31 = vector.load %arg6[%c0_18, %c0_19] : memref<16x64xbf16, #tpu.memory_space<vmem>>, vector<16x64xbf16>
      tpu.vector_store %arg6[%c0_18, %c0_19], %30 {strides = array<i32>} : memref<16x64xbf16, #tpu.memory_space<vmem>>, vector<16x64xbf16>,
    } else {
    }
    return
  }
  func.func @transform_0(%arg0: i32, %arg1: i32, %arg2: i32) -> (i32, i32) {
    %c0_i32 = arith.constant 0 : i32
    return %arg0, %arg2 : i32, i32
  }
  func.func @transform_1(%arg0: i32, %arg1: i32, %arg2: i32) -> (i32, i32) {
    %c0_i32 = arith.constant 0 : i32
    return %arg2, %arg1 : i32, i32
  }
  func.func @transform_2(%arg0: i32, %arg1: i32, %arg2: i32) -> (i32, i32) {
    %c0_i32 = arith.constant 0 : i32
    %c0_i32_0 = arith.constant 0 : i32
    return %c0_i32, %arg1 : i32, i32
  }
  func.func @transform_3(%arg0: i32, %arg1: i32, %arg2: i32) -> (i32, i32) {
    %c0_i32 = arith.constant 0 : i32
    return %arg0, %arg1 : i32, i32
  }
}

module attributes {stable_mosaic.version = 11 : i64} {
  func.func @_dense_res_ln_kernel(%arg0: i32, %arg1: i32, %arg2: memref<16x64xbf16, #tpu.memory_space<vmem>>, %arg3: memref<64x32xbf16, #tpu.memory_space<vmem>>, %arg4: memref<1x32xf32, #tpu.memory_space<vmem>>, %arg5: memref<16x32xf32, #tpu.memory_space<vmem>>, %arg6: memref<1x32xf32, #tpu.memory_space<vmem>>, %arg7: memref<1x32xf32, #tpu.memory_space<vmem>>, %arg8: memref<16x32xf32, #tpu.memory_space<vmem>>) attributes {dimension_semantics = [#tpu.dimension_semantics<parallel>, #tpu.dimension_semantics<arbitrary>], iteration_bounds = array<i64: 1, 1>, scalar_prefetch = 0 : i64, scratch_operands = 0 : i64, tpu.core_type = #tpu.core_type<tc>, window_params = [{transform_indices = @transform_0, window_bounds = array<i64: 16, 64>}, {transform_indices = @transform_1, window_bounds = array<i64: 64, 32>}, {pipeline_mode = #tpu.pipeline_mode<synchronous>, transform_indices = @transform_2, window_bounds = array<i64: 1, 32>}, {transform_indices = @transform_3, window_bounds = array<i64: 16, 32>}, {pipeline_mode = #tpu.pipeline_mode<synchronous>, transform_indices = @transform_4, window_bounds = array<i64: 1, 32>}, {pipeline_mode = #tpu.pipeline_mode<synchronous>, transform_indices = @transform_5, window_bounds = array<i64: 1, 32>}, {transform_indices = @transform_6, window_bounds = array<i64: 16, 32>}]} {
    %c0_i32 = arith.constant 0 : i32
    %0 = arith.cmpi eq, %arg1, %c0_i32 : i32
    %1 = arith.extui %0 : i1 to i32
    %c0_i32_0 = arith.constant 0 : i32
    %2 = arith.cmpi ne, %1, %c0_i32_0 : i32
    scf.if %2 {
      %cst_10 = arith.constant 0.000000e+00 : f32
      %12 = vector.broadcast %cst_10 : f32 to vector<16x32xf32>
      %c0_11 = arith.constant 0 : index
      %c0_12 = arith.constant 0 : index
      %13 = vector.load %arg8[%c0_11, %c0_12] : memref<16x32xf32, #tpu.memory_space<vmem>>, vector<16x32xf32>
      tpu.vector_store %arg8[%c0_11, %c0_12], %12 {strides = array<i32>} : memref<16x32xf32, #tpu.memory_space<vmem>>, vector<16x32xf32>,
    } else {
    }
    %c0 = arith.constant 0 : index
    %c0_1 = arith.constant 0 : index
    %3 = vector.load %arg8[%c0, %c0_1] : memref<16x32xf32, #tpu.memory_space<vmem>>, vector<16x32xf32>
    %c0_2 = arith.constant 0 : index
    %c0_3 = arith.constant 0 : index
    %4 = vector.load %arg2[%c0_2, %c0_3] : memref<16x64xbf16, #tpu.memory_space<vmem>>, vector<16x64xbf16>
    %c0_4 = arith.constant 0 : index
    %c0_5 = arith.constant 0 : index
    %5 = vector.load %arg3[%c0_4, %c0_5] : memref<64x32xbf16, #tpu.memory_space<vmem>>, vector<64x32xbf16>
    %cst = arith.constant dense<0.000000e+00> : vector<16x32xf32>
    %6 = tpu.matmul %4, %5, %cst {dimension_numbers = #tpu.dot_dimension_numbers<[1], [0], [0], [1], [0, 0, 1, 1], [], []>} : vector<16x64xbf16>, vector<64x32xbf16>, vector<16x32xf32> -> vector<16x32xf32>
    %7 = arith.addf %3, %6 : vector<16x32xf32>
    %c0_6 = arith.constant 0 : index
    %c0_7 = arith.constant 0 : index
    %8 = vector.load %arg8[%c0_6, %c0_7] : memref<16x32xf32, #tpu.memory_space<vmem>>, vector<16x32xf32>
    tpu.vector_store %arg8[%c0_6, %c0_7], %7 {strides = array<i32>} : memref<16x32xf32, #tpu.memory_space<vmem>>, vector<16x32xf32>,
    %c0_i32_8 = arith.constant 0 : i32
    %9 = arith.cmpi eq, %arg1, %c0_i32_8 : i32
    %10 = arith.extui %9 : i1 to i32
    %c0_i32_9 = arith.constant 0 : i32
    %11 = arith.cmpi ne, %10, %c0_i32_9 : i32
    scf.if %11 {
      %c0_10 = arith.constant 0 : index
      %c0_11 = arith.constant 0 : index
      %12 = vector.load %arg8[%c0_10, %c0_11] : memref<16x32xf32, #tpu.memory_space<vmem>>, vector<16x32xf32>
      %c0_12 = arith.constant 0 : index
      %c0_13 = arith.constant 0 : index
      %13 = vector.load %arg4[%c0_12, %c0_13] : memref<1x32xf32, #tpu.memory_space<vmem>>, vector<1x32xf32>
      %14 = vector.broadcast %13 : vector<1x32xf32> to vector<16x32xf32>
      %15 = arith.addf %12, %14 : vector<16x32xf32>
      %c0_14 = arith.constant 0 : index
      %c0_15 = arith.constant 0 : index
      %16 = vector.load %arg5[%c0_14, %c0_15] : memref<16x32xf32, #tpu.memory_space<vmem>>, vector<16x32xf32>
      %17 = arith.addf %15, %16 : vector<16x32xf32>
      %cst_16 = arith.constant dense<0.000000e+00> : vector<16xf32>
      %18 = vector.multi_reduction <add>, %17, %cst_16 [1] : vector<16x32xf32> to vector<16xf32>
      %19 = vector.shape_cast %18 : vector<16xf32> to vector<16x1xf32>
      %cst_17 = arith.constant 3.200000e+01 : f32
      %20 = vector.broadcast %cst_17 : f32 to vector<16x1xf32>
      %21 = arith.divf %19, %20 : vector<16x1xf32>
      %22 = vector.broadcast %21 : vector<16x1xf32> to vector<16x32xf32>
      %23 = arith.subf %17, %22 : vector<16x32xf32>
      %24 = arith.mulf %23, %23 : vector<16x32xf32>
      %cst_18 = arith.constant dense<0.000000e+00> : vector<16xf32>
      %25 = vector.multi_reduction <add>, %24, %cst_18 [1] : vector<16x32xf32> to vector<16xf32>
      %26 = vector.shape_cast %25 : vector<16xf32> to vector<16x1xf32>
      %cst_19 = arith.constant 3.200000e+01 : f32
      %27 = vector.broadcast %cst_19 : f32 to vector<16x1xf32>
      %28 = arith.divf %26, %27 : vector<16x1xf32>
      %cst_20 = arith.constant 9.99999996E-13 : f32
      %29 = vector.broadcast %cst_20 : f32 to vector<16x1xf32>
      %30 = arith.addf %28, %29 : vector<16x1xf32>
      %31 = math.rsqrt %30 : vector<16x1xf32>
      %32 = vector.broadcast %31 : vector<16x1xf32> to vector<16x32xf32>
      %33 = arith.mulf %23, %32 : vector<16x32xf32>
      %c0_21 = arith.constant 0 : index
      %c0_22 = arith.constant 0 : index
      %34 = vector.load %arg6[%c0_21, %c0_22] : memref<1x32xf32, #tpu.memory_space<vmem>>, vector<1x32xf32>
      %35 = vector.broadcast %34 : vector<1x32xf32> to vector<16x32xf32>
      %36 = arith.mulf %33, %35 : vector<16x32xf32>
      %c0_23 = arith.constant 0 : index
      %c0_24 = arith.constant 0 : index
      %37 = vector.load %arg7[%c0_23, %c0_24] : memref<1x32xf32, #tpu.memory_space<vmem>>, vector<1x32xf32>
      %38 = vector.broadcast %37 : vector<1x32xf32> to vector<16x32xf32>
      %39 = arith.addf %36, %38 : vector<16x32xf32>
      %c0_25 = arith.constant 0 : index
      %c0_26 = arith.constant 0 : index
      %40 = vector.load %arg8[%c0_25, %c0_26] : memref<16x32xf32, #tpu.memory_space<vmem>>, vector<16x32xf32>
      tpu.vector_store %arg8[%c0_25, %c0_26], %39 {strides = array<i32>} : memref<16x32xf32, #tpu.memory_space<vmem>>, vector<16x32xf32>,
    } else {
    }
    return
  }
  func.func @transform_0(%arg0: i32, %arg1: i32) -> (i32, i32) {
    %c0_i32 = arith.constant 0 : i32
    return %arg0, %arg1 : i32, i32
  }
  func.func @transform_1(%arg0: i32, %arg1: i32) -> (i32, i32) {
    %c0_i32 = arith.constant 0 : i32
    %c0_i32_0 = arith.constant 0 : i32
    return %arg1, %c0_i32 : i32, i32
  }
  func.func @transform_2(%arg0: i32, %arg1: i32) -> (i32, i32) {
    %c0_i32 = arith.constant 0 : i32
    %c0_i32_0 = arith.constant 0 : i32
    %c0_i32_1 = arith.constant 0 : i32
    return %c0_i32, %c0_i32_0 : i32, i32
  }
  func.func @transform_3(%arg0: i32, %arg1: i32) -> (i32, i32) {
    %c0_i32 = arith.constant 0 : i32
    %c0_i32_0 = arith.constant 0 : i32
    return %arg0, %c0_i32 : i32, i32
  }
  func.func @transform_4(%arg0: i32, %arg1: i32) -> (i32, i32) {
    %c0_i32 = arith.constant 0 : i32
    %c0_i32_0 = arith.constant 0 : i32
    %c0_i32_1 = arith.constant 0 : i32
    return %c0_i32, %c0_i32_0 : i32, i32
  }
  func.func @transform_5(%arg0: i32, %arg1: i32) -> (i32, i32) {
    %c0_i32 = arith.constant 0 : i32
    %c0_i32_0 = arith.constant 0 : i32
    %c0_i32_1 = arith.constant 0 : i32
    return %c0_i32, %c0_i32_0 : i32, i32
  }
  func.func @transform_6(%arg0: i32, %arg1: i32) -> (i32, i32) {
    %c0_i32 = arith.constant 0 : i32
    %c0_i32_0 = arith.constant 0 : i32
    return %arg0, %c0_i32 : i32, i32
  }
}

module attributes {stable_mosaic.version = 11 : i64} {
  func.func @_pooler_classifier_kernel(%arg0: i32, %arg1: memref<2x32xf32, #tpu.memory_space<vmem>>, %arg2: memref<32x32xbf16, #tpu.memory_space<vmem>>, %arg3: memref<1x32xf32, #tpu.memory_space<vmem>>, %arg4: memref<32x4xbf16, #tpu.memory_space<vmem>>, %arg5: memref<1x4xf32, #tpu.memory_space<vmem>>, %arg6: memref<2x4xf32, #tpu.memory_space<vmem>>) attributes {dimension_semantics = [#tpu.dimension_semantics<arbitrary>], iteration_bounds = array<i64: 1>, scalar_prefetch = 0 : i64, scratch_operands = 0 : i64, tpu.core_type = #tpu.core_type<tc>, window_params = [{pipeline_mode = #tpu.pipeline_mode<synchronous>, transform_indices = @transform_0, window_bounds = array<i64: 2, 32>}, {pipeline_mode = #tpu.pipeline_mode<synchronous>, transform_indices = @transform_1, window_bounds = array<i64: 32, 32>}, {pipeline_mode = #tpu.pipeline_mode<synchronous>, transform_indices = @transform_2, window_bounds = array<i64: 1, 32>}, {pipeline_mode = #tpu.pipeline_mode<synchronous>, transform_indices = @transform_3, window_bounds = array<i64: 32, 4>}, {pipeline_mode = #tpu.pipeline_mode<synchronous>, transform_indices = @transform_4, window_bounds = array<i64: 1, 4>}, {pipeline_mode = #tpu.pipeline_mode<synchronous>, transform_indices = @transform_5, window_bounds = array<i64: 2, 4>}]} {
    %c0 = arith.constant 0 : index
    %c0_0 = arith.constant 0 : index
    %0 = vector.load %arg1[%c0, %c0_0] : memref<2x32xf32, #tpu.memory_space<vmem>>, vector<2x32xf32>
    %1 = arith.truncf %0 : vector<2x32xf32> to vector<2x32xbf16>
    %c0_1 = arith.constant 0 : index
    %c0_2 = arith.constant 0 : index
    %2 = vector.load %arg2[%c0_1, %c0_2] : memref<32x32xbf16, #tpu.memory_space<vmem>>, vector<32x32xbf16>
    %cst = arith.constant dense<0.000000e+00> : vector<2x32xf32>
    %3 = tpu.matmul %1, %2, %cst {dimension_numbers = #tpu.dot_dimension_numbers<[1], [0], [0], [1], [0, 0, 1, 1], [], []>} : vector<2x32xbf16>, vector<32x32xbf16>, vector<2x32xf32> -> vector<2x32xf32>
    %c0_3 = arith.constant 0 : index
    %c0_4 = arith.constant 0 : index
    %4 = vector.load %arg3[%c0_3, %c0_4] : memref<1x32xf32, #tpu.memory_space<vmem>>, vector<1x32xf32>
    %5 = vector.broadcast %4 : vector<1x32xf32> to vector<2x32xf32>
    %6 = arith.addf %3, %5 : vector<2x32xf32>
    %7 = math.tanh %6 : vector<2x32xf32>
    %8 = arith.truncf %7 : vector<2x32xf32> to vector<2x32xbf16>
    %c0_5 = arith.constant 0 : index
    %c0_6 = arith.constant 0 : index
    %9 = vector.load %arg4[%c0_5, %c0_6] : memref<32x4xbf16, #tpu.memory_space<vmem>>, vector<32x4xbf16>
    %cst_7 = arith.constant dense<0.000000e+00> : vector<2x4xf32>
    %10 = tpu.matmul %8, %9, %cst_7 {dimension_numbers = #tpu.dot_dimension_numbers<[1], [0], [0], [1], [0, 0, 1, 1], [], []>} : vector<2x32xbf16>, vector<32x4xbf16>, vector<2x4xf32> -> vector<2x4xf32>
    %c0_8 = arith.constant 0 : index
    %c0_9 = arith.constant 0 : index
    %11 = vector.load %arg5[%c0_8, %c0_9] : memref<1x4xf32, #tpu.memory_space<vmem>>, vector<1x4xf32>
    %12 = vector.broadcast %11 : vector<1x4xf32> to vector<2x4xf32>
    %13 = arith.addf %10, %12 : vector<2x4xf32>
    %c0_10 = arith.constant 0 : index
    %c0_11 = arith.constant 0 : index
    %14 = vector.load %arg6[%c0_10, %c0_11] : memref<2x4xf32, #tpu.memory_space<vmem>>, vector<2x4xf32>
    tpu.vector_store %arg6[%c0_10, %c0_11], %13 {strides = array<i32>} : memref<2x4xf32, #tpu.memory_space<vmem>>, vector<2x4xf32>,
    return
  }
  func.func @transform_0(%arg0: i32) -> (i32, i32) {
    %c0_i32 = arith.constant 0 : i32
    %c0_i32_0 = arith.constant 0 : i32
    %c0_i32_1 = arith.constant 0 : i32
    return %c0_i32, %c0_i32_0 : i32, i32
  }
  func.func @transform_1(%arg0: i32) -> (i32, i32) {
    %c0_i32 = arith.constant 0 : i32
    %c0_i32_0 = arith.constant 0 : i32
    %c0_i32_1 = arith.constant 0 : i32
    return %c0_i32, %c0_i32_0 : i32, i32
  }
  func.func @transform_2(%arg0: i32) -> (i32, i32) {
    %c0_i32 = arith.constant 0 : i32
    %c0_i32_0 = arith.constant 0 : i32
    %c0_i32_1 = arith.constant 0 : i32
    return %c0_i32, %c0_i32_0 : i32, i32
  }
  func.func @transform_3(%arg0: i32) -> (i32, i32) {
    %c0_i32 = arith.constant 0 : i32
    %c0_i32_0 = arith.constant 0 : i32
    %c0_i32_1 = arith.constant 0 : i32
    return %c0_i32, %c0_i32_0 : i32, i32
  }
  func.func @transform_4(%arg0: i32) -> (i32, i32) {
    %c0_i32 = arith.constant 0 : i32
    %c0_i32_0 = arith.constant 0 : i32
    %c0_i32_1 = arith.constant 0 : i32
    return %c0_i32, %c0_i32_0 : i32, i32
  }
  func.func @transform_5(%arg0: i32) -> (i32, i32) {
    %c0_i32 = arith.constant 0 : i32
    %c0_i32_0 = arith.constant 0 : i32
    %c0_i32_1 = arith.constant 0 : i32
    return %c0_i32, %c0_i32_0 : i32, i32
  }
}

</mosaic_0001>

<bundles_post_ra>
// kernel: intent_model_forward.13
= control target key start
LH: loop header
LB: loop body
LE: loop exit
PB: predicated region body
PF: predicated region fallthrough
CT: control target
= control target key end

     0   :  { %vm19_vm0 = vcmask 785408   ;;  %v145_v0 = vmov 0.0   ;;  %vm146_vm1 = vmmov 0   ;;  %vm43_vm2 = vcmask 261120   ;;  %s192_s1 = inlined_call_operand.vmem [shape: bf16[32,96], index: 1, kind: input, shape index: {}]   ;;  %s193_s0 = inlined_call_operand.vmem [shape: f32[16,32], index: 0, kind: input, shape index: {}]   ;;  %s194_s2 = inlined_call_operand.vmem [shape: f32[1,96], index: 2, kind: input, shape index: {}]   ;;  %s195_s3 = inlined_call_operand.vmem [shape: bf16[16,96], index: 3, kind: output, shape index: {}]  }
   0x1   :  { %133 = vmatprep.subr.bf16.mxu0 %v145_v0  ;;  %v143_v1 = vld [vmem:[%s192_s1] sm:$0xff]   ;;  %137 = vmatprep.mubr.msk.bf16.mxu0 %vm146_vm1, %v145_v0  ;;  %20 = vst.msk [vmem:[#allocation2] sm:$0xff] %vm19_vm0, %v145_v0  ;;  %21 = vst.msk [vmem:[#allocation2 + $0x8] sm:$0xff] %vm19_vm0, %v145_v0  ;;  %v144_v2 = vld [vmem:[%s192_s1 + $0x8] sm:$0xff]   ;;  %vm115_vm3 = vcmask 781312  }
   0x2   :  { %134 = vmatpush3.bf16.msra.mxu0 %v143_v1  ;;  %v24_v3 = vld [vmem:[%s193_s0] sm:$0xff]  ;;  %v25_v4 = vld [vmem:[%s193_s0 + $0x8] sm:$0xff] }
   0x3   :  { %135 = vmatprep.subr.bf16.mxu0 %v145_v0  ;;  %v26_v5 = vpack.c.bf16 %v25_v4, %v24_v3  ;;  %v125_v14 = vld [vmem:[%s194_s2] ss:$0 sm:$0xff] }
   0x6   :  { %136 = vmatpush3.bf16.msra.mxu0 %v144_v2 }
   0x8   :  { %v22_v6 = vld [vmem:[#allocation2] sm:$0xff]  ;;  %v23_v8 = vld [vmem:[#allocation2 + $0x8] sm:$0xff] }
   0x9   :  { %138 = vmatmul.mubr.msk.bf16.vlgmr.msra.gmra.mrb[0].mxu0 %vm43_vm2, %v26_v5 }
  0xdc   :  { %v81_v7 = vpop.f32.mrb[0].mxu0 }
  0xdd   :  { %v88_v9 = vadd.f32 %v81_v7, %v22_v6  ;;  %v139_v10 = vpop.f32.mrb[1].mxu0 }
  0xde   :  { %v84_v11 = vpop.f32.mrb[2].mxu0 }
  0xdf   :  { %91 = vst.msk [vmem:[#allocation2] sm:$0xff] %vm19_vm0, %v88_v9  ;;  %v89_v12 = vadd.f32 %v84_v11, %v23_v8  ;;  %v140_v13 = vpop.f32.mrb[3].mxu0 }
  0xe1   :  { %92 = vst.msk [vmem:[#allocation2 + $0x8] sm:$0xff] %vm19_vm0, %v89_v12 }
  0xe6   :  { %v96_v15 = vld [vmem:[#allocation2] sm:$0xff] }
  0xe7   :  { %v105_v16 = vadd.f32 %v125_v14, %v96_v15 }
  0xe8   :  { %v97_v17 = vld [vmem:[#allocation2 + $0x8] sm:$0xff] }
  0xe9   :  { %v128_v18 = vpack.c.bf16 %v105_v16, %v105_v16  ;;  %v106_v19 = vadd.f32 %v125_v14, %v97_v17 }
  0xeb   :  { %116 = vst.msk [vmem:[%s195_s3] sm:$0xf] %vm115_vm3, %v128_v18  ;;  %v129_v20 = vpack.c.bf16 %v106_v19, %v106_v19 }
  0xed   :  { %117 = vst.msk [vmem:[%s195_s3 + $0x4] sm:$0xf] %vm115_vm3, %v129_v20 }

// kernel: intent_model_forward.12
= control target key start
LH: loop header
LB: loop body
LE: loop exit
PB: predicated region body
PF: predicated region fallthrough
CT: control target
= control target key end

     0   :  { %vm16_vm0 = vcmask 261120   ;;  %s118_s0 = inlined_call_operand.vmem [shape: f32[16,32], index: 0, kind: input, shape index: {}]   ;;  %s119_s1 = inlined_call_operand.vmem [shape: f32[1,32], index: 1, kind: input, shape index: {}]   ;;  %s120_s2 = inlined_call_operand.vmem [shape: f32[1,32], index: 2, kind: input, shape index: {}]   ;;  %s121_s3 = inlined_call_operand.vmem [shape: f32[16,32], index: 3, kind: output, shape index: {}]  }
   0x1   :  { %v14_v0 = vld [vmem:[%s118_s0] sm:$0xff]  ;;  %v15_v1 = vld [vmem:[%s118_s0 + $0x8] sm:$0xff] }
   0x2   :  { %v17_v2 = vsel %vm16_vm0, %v14_v0, 0.0  ;;  %v20_v3 = vsel %vm16_vm0, %v15_v1, 0.0  ;;  %v68_v21 = vld [vmem:[%s119_s1] ss:$0 sm:$0xff] }
   0x3   :  { %18 = vadd.xlane.f32.xlu0 %v17_v2  ;;  %v69_v23 = vld [vmem:[%s120_s2] ss:$0 sm:$0xff] }
   0x7   :  { %21 = vadd.xlane.f32.xlu0 %v20_v3 }
  0x90   :  { %v19_v4 = vpop.xlane.xlu0 %18 }
  0x91   :  { %v24_v5 = vmul.f32 0.03125, %v19_v4 }
  0x93   :  { %v26_v6 = vsub.f32 %v14_v0, %v24_v5 }
  0x94   :  { %v22_v7 = vpop.xlane.xlu0 %21 }
  0x95   :  { %v25_v8 = vmul.f32 0.03125, %v22_v7  ;;  %v28_v9 = vmul.f32 %v26_v6, %v26_v6 }
  0x97   :  { %v27_v10 = vsub.f32 %v15_v1, %v25_v8  ;;  %v30_v11 = vsel %vm16_vm0, %v28_v9, 0.0 }
  0x98   :  { %31 = vadd.xlane.f32.xlu1 %v30_v11 }
  0x99   :  { %v29_v12 = vmul.f32 %v27_v10, %v27_v10 }
  0x9b   :  { %v33_v13 = vsel %vm16_vm0, %v29_v12, 0.0 }
  0x9c   :  { %34 = vadd.xlane.f32.xlu1 %v33_v13 }
 0x125   :  { %v32_v14 = vpop.xlane.xlu1 %31 }
 0x126   :  { %v36_v15 = vmul.f32 0.03125, %v32_v14 }
 0x128   :  { %v38_v16 = vadd.f32 1e-12, %v36_v15 }
 0x129   :  { %v35_v17 = vpop.xlane.xlu1 %34 }
 0x12a   :  { %70 = vrsqrt.f32 %v38_v16  ;;  %v37_v18 = vmul.f32 0.03125, %v35_v17 }
 0x12c   :  { %v39_v19 = vadd.f32 1e-12, %v37_v18 }
 0x12e   :  { %72 = vrsqrt.f32 %v39_v19 }
 0x134   :  { %v71_v20 = vpop.eup %70 }
 0x135   :  { %v42_v22 = vmul.f32 %v71_v20, %v26_v6 }
 0x137   :  { %v51_v24 = vmul.f32 %v68_v21, %v42_v22 }
 0x138   :  { %v73_v25 = vpop.eup %72 }
 0x139   :  { %v60_v26 = vadd.f32 %v69_v23, %v51_v24  ;;  %v43_v27 = vmul.f32 %v73_v25, %v27_v10 }
 0x13b   :  { %62 = vst.msk [vmem:[%s121_s3] sm:$0xff] %vm16_vm0, %v60_v26  ;;  %v52_v28 = vmul.f32 %v68_v21, %v43_v27 }
 0x13d   :  { %v61_v29 = vadd.f32 %v69_v23, %v52_v28 }
 0x13f   :  { %63 = vst.msk [vmem:[%s121_s3 + $0x8] sm:$0xff] %vm16_vm0, %v61_v29 }

// kernel: intent_model_forward.15
= control target key start
LH: loop header
LB: loop body
LE: loop exit
PB: predicated region body
PF: predicated region fallthrough
CT: control target
= control target key end

     0   :  { %vm28_vm0 = vcmask 261120   ;;  %v201_v0 = vmov 0.0   ;;  %vm202_vm1 = vmmov 0   ;;  %s303_s6 = inlined_call_operand.vmem [shape: f32[16,32], index: 6, kind: output, shape index: {}]   ;;  %s304_s1 = inlined_call_operand.vmem [shape: bf16[32,32], index: 1, kind: input, shape index: {}]   ;;  %s305_s0 = inlined_call_operand.vmem [shape: bf16[16,32], index: 0, kind: input, shape index: {}]   ;;  %s306_s2 = inlined_call_operand.vmem [shape: f32[1,32], index: 2, kind: input, shape index: {}]   ;;  %s307_s3 = inlined_call_operand.vmem [shape: f32[16,32], index: 3, kind: input, shape index: {}]   ;;  %s308_s4 = inlined_call_operand.vmem [shape: f32[1,32], index: 4, kind: input, shape index: {}]   ;;  %s309_s5 = inlined_call_operand.vmem [shape: f32[1,32], index: 5, kind: input, shape index: {}]  }
   0x1   :  { %29 = vst.msk [vmem:[%s303_s6] sm:$0xff] %vm28_vm0, %v201_v0  ;;  %30 = vst.msk [vmem:[%s303_s6 + $0x8] sm:$0xff] %vm28_vm0, %v201_v0  ;;  %184 = vmatprep.subr.bf16.mxu0 %v201_v0  ;;  %v194_v1 = vld [vmem:[%s304_s1] sm:$0xff]   ;;  %188 = vmatprep.mubr.msk.bf16.mxu0 %vm202_vm1, %v201_v0  ;;  %v195_v2 = vld [vmem:[%s304_s1 + $0x8] sm:$0xff]  }
   0x2   :  { %185 = vmatpush3.bf16.msra.mxu0 %v194_v1  ;;  %v196_v3 = vld [vmem:[%s305_s0] sm:$0xff]   ;;  %v120_v17 = vld [vmem:[%s307_s3 + $0x8] sm:$0xff] }
   0x3   :  { %186 = vmatprep.subr.bf16.mxu0 %v201_v0  ;;  %v178_v12 = vld [vmem:[%s306_s2] ss:$0 sm:$0xff] }
   0x4   :  { %v119_v14 = vld [vmem:[%s307_s3] sm:$0xff] }
   0x5   :  { %v179_v40 = vld [vmem:[%s308_s4] ss:$0 sm:$0xff] }
   0x6   :  { %187 = vmatpush3.bf16.msra.mxu0 %v195_v2  ;;  %v180_v42 = vld [vmem:[%s309_s5] ss:$0 sm:$0xff] }
   0x8   :  { %v31_v4 = vld [vmem:[%s303_s6] sm:$0xff]  ;;  %v32_v6 = vld [vmem:[%s303_s6 + $0x8] sm:$0xff] }
   0x9   :  { %189 = vmatmul.mubr.msk.bf16.vlgmr.msra.gmra.mrb[0].mxu0 %vm28_vm0, %v196_v3 }
  0xdc   :  { %v94_v5 = vpop.f32.mrb[0].mxu0 }
  0xdd   :  { %v101_v7 = vadd.f32 %v94_v5, %v31_v4  ;;  %v190_v8 = vpop.f32.mrb[1].mxu0 }
  0xde   :  { %v97_v9 = vpop.f32.mrb[2].mxu0 }
  0xdf   :  { %103 = vst.msk [vmem:[%s303_s6] sm:$0xff] %vm28_vm0, %v101_v7  ;;  %v102_v10 = vadd.f32 %v97_v9, %v32_v6  ;;  %v191_v11 = vpop.f32.mrb[3].mxu0 }
  0xe1   :  { %104 = vst.msk [vmem:[%s303_s6 + $0x8] sm:$0xff] %vm28_vm0, %v102_v10 }
  0xe6   :  { %v108_v13 = vld [vmem:[%s303_s6] sm:$0xff] }
  0xe7   :  { %v117_v15 = vadd.f32 %v178_v12, %v108_v13 }
  0xe8   :  { %v109_v16 = vld [vmem:[%s303_s6 + $0x8] sm:$0xff] }
  0xe9   :  { %v121_v18 = vadd.f32 %v119_v14, %v117_v15  ;;  %v118_v19 = vadd.f32 %v178_v12, %v109_v16 }
  0xeb   :  { %v123_v20 = vsel %vm28_vm0, %v121_v18, 0.0  ;;  %v122_v21 = vadd.f32 %v120_v17, %v118_v19 }
  0xec   :  { %124 = vadd.xlane.f32.xlu0 %v123_v20 }
  0xed   :  { %v126_v22 = vsel %vm28_vm0, %v122_v21, 0.0 }
  0xf0   :  { %127 = vadd.xlane.f32.xlu0 %v126_v22 }
 0x179   :  { %v125_v23 = vpop.xlane.xlu0 %124 }
 0x17a   :  { %v130_v24 = vmul.f32 0.03125, %v125_v23 }
 0x17c   :  { %v132_v25 = vsub.f32 %v121_v18, %v130_v24 }
 0x17d   :  { %v128_v26 = vpop.xlane.xlu0 %127 }
 0x17e   :  { %v131_v27 = vmul.f32 0.03125, %v128_v26  ;;  %v134_v28 = vmul.f32 %v132_v25, %v132_v25 }
 0x180   :  { %v133_v29 = vsub.f32 %v122_v21, %v131_v27  ;;  %v136_v30 = vsel %vm28_vm0, %v134_v28, 0.0 }
 0x181   :  { %137 = vadd.xlane.f32.xlu1 %v136_v30 }
 0x182   :  { %v135_v31 = vmul.f32 %v133_v29, %v133_v29 }
 0x184   :  { %v139_v32 = vsel %vm28_vm0, %v135_v31, 0.0 }
 0x185   :  { %140 = vadd.xlane.f32.xlu1 %v139_v32 }
 0x20e   :  { %v138_v33 = vpop.xlane.xlu1 %137 }
 0x20f   :  { %v142_v34 = vmul.f32 0.03125, %v138_v33 }
 0x211   :  { %v144_v35 = vadd.f32 1e-12, %v142_v34 }
 0x212   :  { %v141_v36 = vpop.xlane.xlu1 %140 }
 0x213   :  { %197 = vrsqrt.f32 %v144_v35  ;;  %v143_v37 = vmul.f32 0.03125, %v141_v36 }
 0x215   :  { %v145_v38 = vadd.f32 1e-12, %v143_v37 }
 0x217   :  { %199 = vrsqrt.f32 %v145_v38 }
 0x21d   :  { %v198_v39 = vpop.eup %197 }
 0x21e   :  { %v148_v41 = vmul.f32 %v198_v39, %v132_v25 }
 0x220   :  { %v157_v43 = vmul.f32 %v179_v40, %v148_v41 }
 0x221   :  { %v200_v44 = vpop.eup %199 }
 0x222   :  { %v166_v45 = vadd.f32 %v180_v42, %v157_v43  ;;  %v149_v46 = vmul.f32 %v200_v44, %v133_v29 }
 0x224   :  { %168 = vst.msk [vmem:[%s303_s6] sm:$0xff] %vm28_vm0, %v166_v45  ;;  %v158_v47 = vmul.f32 %v179_v40, %v149_v46 }
 0x226   :  { %v167_v48 = vadd.f32 %v180_v42, %v158_v47 }
 0x228   :  { %169 = vst.msk [vmem:[%s303_s6 + $0x8] sm:$0xff] %vm28_vm0, %v167_v48 }

// kernel: intent_model_forward.14
= control target key start
LH: loop header
LB: loop body
LE: loop exit
PB: predicated region body
PF: predicated region fallthrough
CT: control target
= control target key end

     0   :  { %s875_s9 = smov 0   ;;  %s976_s0 = inlined_call_operand.vmem [shape: bf16[2,8,96], index: 0, kind: input, shape index: {}]   ;;  %s977_s1 = inlined_call_operand.vmem [shape: f32[2,1,8], index: 1, kind: input, shape index: {}]   ;;  %s978_s2 = inlined_call_operand.vmem [shape: bf16[2,8,32], index: 2, kind: output, shape index: {}]  }
   0x1 LB: > { %s706_s10 = sadd.s32 4294967295, %s842_s9   ;;  %p710_p0 = scmp.ge.s32.totalorder %s842_s9, 1  ;;  %s842_s9 = sphi %s875_s9, %s12_s9  }
   0x2   : > { %p119_p1 = scmp.lt.s32.totalorder %s842_s9, 3 }
   0x4   : > { %p120_p2 = pnand %p710_p0, %p119_p1 }
   0x5   : > { %p142_p3 = scmp.lt.s32.totalorder (!%p120_p2), %s706_s10, 1  ;;  %v844_v0 = vmov (!%p120_p2), 0.0   ;;  %vm845_vm0 = vmmov (!%p120_p2), 0   ;;  %s846_s15 = smov (!%p120_p2), 96   ;;  %vm170_vm1 = vcmask (!%p120_p2), 64512   ;;  %vm234_vm2 = vcmask (!%p120_p2), 1043456  }
   0x6   : > { %123 = sbr.rel (%p120_p2) target bundleno = 1609 (0x649), region = 28  ;;  %744 = vmatprep.subr.bf16.mxu0 (!%p120_p2), %v844_v0  ;;  %746 = vmatprep.mubr.msk.bf16.mxu0 (!%p120_p2), %vm845_vm0, %v844_v0  ;;  %s847_s16 = smov (!%p120_p2), 64   ;;  %vm398_vm3 = vcmask (!%p120_p2), 130112   ;;  %vm518_vm4 = vcmask (!%p120_p2), 195712   ;;  %vm638_vm5 = vcmask (!%p120_p2), 261312   ;;  %vm642_vm6 = vcmask (!%p120_p2), 257024  }
   0x7   : > { %750 = vmatprep.subr.bf16.mxu1 (!%p120_p2), %v844_v0  ;;  %752 = vmatprep.mubr.msk.bf16.mxu1 (!%p120_p2), %vm845_vm0, %v844_v0  ;;  %s848_s17 = smov (!%p120_p2), 88   ;;  %s849_s21 = smov (!%p120_p2), 72  }
   0x8   : > { %s850_s22 = smov (!%p120_p2), 120   ;;  %s851_s23 = smov (!%p120_p2), 80  }
   0x9   : > { %s852_s24 = smov (!%p120_p2), 112   ;;  %s853_s25 = smov (!%p120_p2), 104  }
   0xa   : > { %s854_s26 = smov (!%p120_p2), 56   ;;  %s855_s27 = smov (!%p120_p2), 48  }
   0xb   : > { %s856_s28 = smov (!%p120_p2), 40   ;;  %s857_s29 = smov (!%p120_p2), 8  }
   0xc   : > { %s858_s30 = smov (!%p120_p2), 16   ;;  %s859_s3 = smov (!%p120_p2), 24  }
   0xd   : > { %s980_s10 = smov (!%p142_p3, %s706_s10), 1 }
   0xe   : > { %s711_s11 = sshll.u32 %s980_s10, 2  ;;  %s148_s20 = scalar_lea.vmem %s977_s1, %s980_s10 }
   0xf   : > { %s897_s14 = scalar_lea.vmem %s976_s0, %s711_s11  ;;  %v913_v9 = vld [vmem:[%s148_s20] ss:$0 sm:$0xff]  ;;  %s152_s6 = scalar_lea.vmem %s978_s2, %s711_s11 }
  0x10   : > { %v154_v1 = vld [vmem:[%s897_s14] sm:$0xf] }
  0x11   : > { %v714_v2 = vcombine.low %v154_v1, %v154_v1  ;;  %v155_v3 = vunpack.c.l.bf16 %v154_v1  ;;  %v906_v8 = vld [vmem:[%s897_s14] ss:$0 sps:$4 sm:$0xff]  }
  0x12   : > { %v918_v16 = vld [vmem:[%s897_s14] ss:$0 sps:$4 sm:$0xff]  }
  0x13   : > { %168 = vrot.lane.b32.xlu0 %v714_v2, %s846_s15  ;;  %v156_v5 = vmul.f32 0.35355338, %v155_v3  ;;  %229 = vrot.lane.b32.xlu1 %v714_v2, %s847_s16  ;;  %v925_v24 = vld [vmem:[%s897_s14] ss:$0 sps:$4 sm:$0xff]  }
  0x15   : > { %v157_v7 = vpack.c.bf16 %v156_v5, %v156_v5 }
  0x17   : > { %286 = vrot.lane.b32.xlu1 %v906_v8, %s848_s17 }
  0x85   : > { %v169_v4 = vpop.permute.xlu0 %168  ;;  %v230_v17 = vpop.permute.xlu1 %229 }
  0x86   : > { %v175_v6 = vsel %vm170_vm1, %v169_v4, 0  ;;  %v236_v18 = vsel %vm234_vm2, %v230_v17, 0 }
  0x87   : > { %745 = vmatpush3.bf16.xpose.msra.mxu0 %v175_v6  ;;  %751 = vmatpush3.bf16.msra.mxu1 %v236_v18 }
  0x88   : > { %762 = vmatprep.subr.bf16.mxu0 %v844_v0  ;;  %756 = vmatprep.subr.bf16.mxu1 %v844_v0 }
  0x89   : > { %v287_v25 = vpop.permute.xlu1 %286 }
  0x8a   : > { %v292_v31 = vsel %vm170_vm1, %v287_v25, 0 }
  0x8e   : > { %747 = vmatmul.mubr.msk.bf16.vlgmr.msra.gmra.mrb[0].mxu0 %vm170_vm1, %v157_v7 }
  0x8f   : > { %764 = vmatprep.mubr.msk.bf16.mxu0 %vm845_vm0, %v844_v0 }
 0x161   : > { %v211_v10 = vpop.f32.mrb[0].mxu0 }
 0x162   : > { %v212_v11 = vadd.f32 %v913_v9, %v211_v10  ;;  %v748_v12 = vpop.f32.mrb[1].mxu0 }
 0x163   : > { %v214_v13 = vpop.f32.mrb[2].mxu0 }
 0x164   : > { %v749_v14 = vpop.f32.mrb[3].mxu0  ;;  %v217_v15 = vsel %vm170_vm1, %v212_v11, -inf }
 0x165   : > { %218 = vmax.xlane.f32.xlu0 %v217_v15 }
 0x17b   : > { %526 = vrot.lane.b32.xlu0 %v918_v16, %s849_s21 }
 0x1f2   : > { %v219_v19 = vpop.xlane.xlu0 %218 }
 0x1f3   : > { %v220_v20 = vsub.f32 %v212_v11, %v219_v19 }
 0x1f5   : > { %v221_v21 = vmul.f32 1.442695, %v220_v20 }
 0x1f6   : > { %v527_v34 = vpop.permute.xlu0 %526 }
 0x1f7   : > { %820 = vpow2.f32 %v221_v21  ;;  %v532_v36 = vsel %vm170_vm1, %v527_v34, 0 }
 0x201   : > { %v821_v22 = vpop.eup %820 }
 0x202   : > { %v223_v23 = vsel %vm170_vm1, %v821_v22, 0.0 }
 0x203   : > { %224 = vadd.xlane.f32.xlu1 %v223_v23 }
 0x214   : > { %281 = vrot.lane.b32.xlu1 %v157_v7, %s850_s22 }
 0x218   : > { %406 = vrot.lane.b32.xlu1 %v925_v24, %s851_s23 }
 0x21c   : > { %401 = vrot.lane.b32.xlu1 %v157_v7, %s852_s24 }
 0x220   : > { %521 = vrot.lane.b32.xlu1 %v157_v7, %s853_s25 }
 0x290   : > { %v225_v26 = vpop.xlane.xlu1 %224 }
 0x291   : > { %822 = vrcp.f32 %v225_v26 }
 0x294   : > { %v282_v29 = vpop.permute.xlu1 %281 }
 0x298   : > { %v407_v32 = vpop.permute.xlu1 %406 }
 0x299   : > { %v412_v33 = vsel %vm170_vm1, %v407_v32, 0 }
 0x29b   : > { %v823_v27 = vpop.eup %822 }
 0x29c   : > { %v227_v28 = vmul.f32 %v823_v27, %v821_v22  ;;  %v402_v35 = vpop.permute.xlu1 %401 }
 0x29e   : > { %v228_v30 = vpack.c.bf16 %v227_v28, %v227_v28 }
 0x2a0   : > { %753 = vmatmul.mubr.msk.bf16.vlgmr.msra.gmra.mrb[0].mxu1 %vm170_vm1, %v228_v30  ;;  %v522_v37 = vpop.permute.xlu1 %521 }
 0x2a1   : > { %757 = vmatpush3.bf16.xpose.msra.mxu1 %v292_v31  ;;  %758 = vmatprep.mubr.msk.bf16.mxu1 %vm845_vm0, %v844_v0 }
 0x2a2   : > { %768 = vmatprep.subr.bf16.mxu1 %v844_v0 }
 0x2a8   : > { %759 = vmatmul.mubr.msk.bf16.vlgmr.msra.gmra.mrb[4].mxu1 %vm170_vm1, %v282_v29 }
 0x2a9   : > { %769 = vmatpush3.bf16.xpose.msra.mxu1 %v412_v33  ;;  %770 = vmatprep.mubr.msk.bf16.mxu1 %vm845_vm0, %v844_v0 }
 0x2aa   : > { %780 = vmatprep.subr.bf16.mxu1 %v844_v0 }
 0x2b0   : > { %771 = vmatmul.mubr.msk.bf16.vlgmr.msra.gmra.mrb[8].mxu1 %vm170_vm1, %v402_v35 }
 0x2b1   : > { %781 = vmatpush3.bf16.xpose.msra.mxu1 %v532_v36  ;;  %782 = vmatprep.mubr.msk.bf16.mxu1 %vm845_vm0, %v844_v0 }
 0x2b8   : > { %783 = vmatmul.mubr.msk.bf16.vlgmr.msra.gmra.mrb[12].mxu1 %vm170_vm1, %v522_v37 }
 0x373   : > { %v272_v38 = vpop.f32.mrb[0].mxu1 }
 0x374   : > { %278 = vst.msk [vmem:[#allocation2] sm:$0xff] %vm170_vm1, %v272_v38  ;;  %v754_v39 = vpop.f32.mrb[1].mxu1 }
 0x375   : > { %v275_v40 = vpop.f32.mrb[2].mxu1 }
 0x376   : > { %v755_v41 = vpop.f32.mrb[3].mxu1 }
 0x37b   : > { %v328_v42 = vpop.f32.mrb[4].mxu1 }
 0x37c   : > { %v329_v43 = vadd.f32 %v913_v9, %v328_v42  ;;  %v760_v44 = vpop.f32.mrb[5].mxu1 }
 0x37d   : > { %v331_v45 = vpop.f32.mrb[6].mxu1 }
 0x37e   : > { %v761_v46 = vpop.f32.mrb[7].mxu1  ;;  %v334_v47 = vsel %vm170_vm1, %v329_v43, -inf }
 0x37f   : > { %335 = vmax.xlane.f32.xlu1 %v334_v47 }
 0x383   : > { %v448_v48 = vpop.f32.mrb[8].mxu1 }
 0x384   : > { %v449_v49 = vadd.f32 %v913_v9, %v448_v48  ;;  %v772_v50 = vpop.f32.mrb[9].mxu1 }
 0x385   : > { %v451_v51 = vpop.f32.mrb[10].mxu1 }
 0x386   : > { %v454_v52 = vsel %vm170_vm1, %v449_v49, -inf  ;;  %v773_v53 = vpop.f32.mrb[11].mxu1 }
 0x387   : > { %455 = vmax.xlane.f32.xlu0 %v454_v52 }
 0x38b   : > { %v568_v54 = vpop.f32.mrb[12].mxu1 }
 0x38c   : > { %v569_v55 = vadd.f32 %v913_v9, %v568_v54  ;;  %v784_v56 = vpop.f32.mrb[13].mxu1 }
 0x38d   : > { %v571_v57 = vpop.f32.mrb[14].mxu1 }
 0x38e   : > { %v574_v58 = vsel %vm170_vm1, %v569_v55, -inf  ;;  %v785_v59 = vpop.f32.mrb[15].mxu1 }
 0x38f   : > { %575 = vmax.xlane.f32.xlu1 %v574_v58 }
 0x40c   : > { %v336_v60 = vpop.xlane.xlu1 %335 }
 0x40d   : > { %v337_v61 = vsub.f32 %v329_v43, %v336_v60 }
 0x40f   : > { %v338_v62 = vmul.f32 1.442695, %v337_v61 }
 0x411   : > { %824 = vpow2.f32 %v338_v62 }
 0x414   : > { %v456_v7 = vpop.xlane.xlu0 %455 }
 0x415   : > { %v457_v9 = vsub.f32 %v449_v49, %v456_v7 }
 0x417   : > { %v458_v10 = vmul.f32 1.442695, %v457_v9 }
 0x41b   : > { %v825_v63 = vpop.eup %824 }
 0x41c   : > { %v576_v1 = vpop.xlane.xlu1 %575  ;;  %v340_v2 = vsel %vm170_vm1, %v825_v63, 0.0 }
 0x41d   : > { %v577_v3 = vsub.f32 %v569_v55, %v576_v1  ;;  %341 = vadd.xlane.f32.xlu1 %v340_v2 }
 0x41f   : > { %v578_v4 = vmul.f32 1.442695, %v577_v3 }
 0x421   : > { %826 = vpow2.f32 %v578_v4 }
 0x422   : > { %828 = vpow2.f32 %v458_v10 }
 0x42b   : > { %v827_v5 = vpop.eup %826 }
 0x42c   : > { %v580_v6 = vsel %vm170_vm1, %v827_v5, 0.0  ;;  %v829_v11 = vpop.eup %828 }
 0x42d   : > { %581 = vadd.xlane.f32.xlu0 %v580_v6  ;;  %v460_v12 = vsel %vm170_vm1, %v829_v11, 0.0 }
 0x42e   : > { %346 = vrot.lane.b32.xlu1 %v906_v8, %s854_s26 }
 0x443   : > { %466 = vrot.lane.b32.xlu0 %v925_v24, %s855_s27 }
 0x452   : > { %461 = vadd.xlane.f32.xlu1 %v460_v12 }
 0x463   : > { %586 = vrot.lane.b32.xlu1 %v918_v16, %s856_s28 }
 0x4aa   : > { %v342_v13 = vpop.xlane.xlu1 %341 }
 0x4ab   : > { %830 = vrcp.f32 %v342_v13 }
 0x4ae   : > { %v347_v14 = vpop.permute.xlu1 %346 }
 0x4af   : > { %v352_v15 = vsel %vm234_vm2, %v347_v14, 0 }
 0x4b0   : > { %763 = vmatpush3.bf16.msra.mxu0 %v352_v15 }
 0x4b1   : > { %774 = vmatprep.subr.bf16.mxu0 %v844_v0 }
 0x4b5   : > { %v831_v8 = vpop.eup %830 }
 0x4b6   : > { %v344_v17 = vmul.f32 %v831_v8, %v825_v63 }
 0x4b8   : > { %v345_v18 = vpack.c.bf16 %v344_v17, %v344_v17 }
 0x4ba   : > { %765 = vmatmul.mubr.msk.bf16.vlgmr.msra.gmra.mrb[4].mxu0 %vm170_vm1, %v345_v18  ;;  %v582_v19 = vpop.xlane.xlu0 %581 }
 0x4bb   : > { %776 = vmatprep.mubr.msk.bf16.mxu0 %vm845_vm0, %v844_v0 }
 0x4be   : > { %v467_v20 = vpop.permute.xlu0 %466 }
 0x4bf   : > { %v472_v16 = vsel %vm234_vm2, %v467_v20, 0 }
 0x4c0   : > { %775 = vmatpush3.bf16.msra.mxu0 %v472_v16 }
 0x4c1   : > { %786 = vmatprep.subr.bf16.mxu0 %v844_v0 }
 0x4df   : > { %v462_v21 = vpop.xlane.xlu1 %461 }
 0x4e0   : > { %832 = vrcp.f32 %v462_v21 }
 0x4e1   : > { %834 = vrcp.f32 %v582_v19 }
 0x4e3   : > { %v587_v23 = vpop.permute.xlu1 %586 }
 0x4e4   : > { %v592_v25 = vsel %vm234_vm2, %v587_v23, 0 }
 0x4ea   : > { %v833_v22 = vpop.eup %832 }
 0x4eb   : > { %v464_v24 = vmul.f32 %v833_v22, %v829_v11  ;;  %v835_v27 = vpop.eup %834 }
 0x4ec   : > { %v584_v28 = vmul.f32 %v835_v27, %v827_v5 }
 0x4ed   : > { %v465_v26 = vpack.c.bf16 %v464_v24, %v464_v24 }
 0x4ee   : > { %v585_v29 = vpack.c.bf16 %v584_v28, %v584_v28 }
 0x4ef   : > { %777 = vmatmul.mubr.msk.bf16.vlgmr.msra.gmra.mrb[8].mxu0 %vm170_vm1, %v465_v26 }
 0x4f0   : > { %787 = vmatpush3.bf16.msra.mxu0 %v592_v25  ;;  %788 = vmatprep.mubr.msk.bf16.mxu0 %vm845_vm0, %v844_v0 }
 0x4f7   : > { %789 = vmatmul.mubr.msk.bf16.vlgmr.msra.gmra.mrb[12].mxu0 %vm170_vm1, %v585_v29 }
 0x58d   : > { %v388_v30 = vpop.f32.mrb[4].mxu0 }
 0x58e   : > { %395 = vrot.lane.b32.xlu1 %v388_v30, %s857_s29  ;;  %v766_v31 = vpop.f32.mrb[5].mxu0 }
 0x58f   : > { %v391_v32 = vpop.f32.mrb[6].mxu0 }
 0x590   : > { %v767_v33 = vpop.f32.mrb[7].mxu0 }
 0x5c2   : > { %v508_v34 = vpop.f32.mrb[8].mxu0 }
 0x5c3   : > { %515 = vrot.lane.b32.xlu0 %v508_v34, %s858_s30  ;;  %v778_v35 = vpop.f32.mrb[9].mxu0 }
 0x5c4   : > { %v511_v36 = vpop.f32.mrb[10].mxu0 }
 0x5c5   : > { %v779_v37 = vpop.f32.mrb[11].mxu0 }
 0x5ca   : > { %v628_v38 = vpop.f32.mrb[12].mxu0 }
 0x5cb   : > { %635 = vrot.lane.b32.xlu1 %v628_v38, %s859_s3  ;;  %v790_v0 = vpop.f32.mrb[13].mxu0 }
 0x5cc   : > { %v631_v39 = vpop.f32.mrb[14].mxu0 }
 0x5cd   : > { %v791_v40 = vpop.f32.mrb[15].mxu0 }
 0x600   : > { %v396_v41 = vpop.permute.xlu1 %395 }
 0x601   : > { %399 = vst.msk [vmem:[#allocation2] sm:$0xff] %vm398_vm3, %v396_v41 }
 0x635   : > { %v516_v42 = vpop.permute.xlu0 %515 }
 0x636   : > { %519 = vst.msk [vmem:[#allocation2] sm:$0xff] %vm518_vm4, %v516_v42 }
 0x63d   : > { %v636_v43 = vpop.permute.xlu1 %635 }
 0x63e   : > { %639 = vst.msk [vmem:[#allocation2] sm:$0xff] %vm638_vm5, %v636_v43 }
 0x645   : > { %v640_v44 = vld [vmem:[#allocation2] sm:$0xff] }
 0x646   : > { %v641_v45 = vpack.c.bf16 %v640_v44, %v640_v44 }
 0x648   : > { %643 = vst.msk [vmem:[%s152_s6] sm:$0xf] %vm642_vm6, %v641_v45 }
 0x649 PF: > { %s12_s9 = sadd.s32 1, %s842_s9  }
 0x64a   : > { %p9_p4 = scmp.ge.s32.totalorder %s12_s9, 4  }
 0x64c   :  { %11 = sbr.rel (!%p9_p4) target bundleno = 1 (0x1), region = 61 }

// kernel: intent_model_forward.16
= control target key start
LH: loop header
LB: loop body
LE: loop exit
PB: predicated region body
PF: predicated region fallthrough
CT: control target
= control target key end

     0   :  { %vm19_vm0 = vcmask 523264   ;;  %v167_v0 = vmov 0.0   ;;  %vm168_vm1 = vmmov 0   ;;  %vm43_vm2 = vcmask 261120   ;;  %s214_s1 = inlined_call_operand.vmem [shape: bf16[32,64], index: 1, kind: input, shape index: {}]   ;;  %s215_s0 = inlined_call_operand.vmem [shape: f32[16,32], index: 0, kind: input, shape index: {}]   ;;  %s216_s2 = inlined_call_operand.vmem [shape: f32[1,64], index: 2, kind: input, shape index: {}]   ;;  %s217_s3 = inlined_call_operand.vmem [shape: bf16[16,64], index: 3, kind: output, shape index: {}]  }
   0x1   :  { %151 = vmatprep.subr.bf16.mxu0 %v167_v0  ;;  %v161_v1 = vld [vmem:[%s214_s1] sm:$0xff]   ;;  %155 = vmatprep.mubr.msk.bf16.mxu0 %vm168_vm1, %v167_v0  ;;  %20 = vst.msk [vmem:[#allocation2] sm:$0xff] %vm19_vm0, %v167_v0  ;;  %21 = vst.msk [vmem:[#allocation2 + $0x8] sm:$0xff] %vm19_vm0, %v167_v0  ;;  %v162_v2 = vld [vmem:[%s214_s1 + $0x8] sm:$0xff]   ;;  %vm133_vm3 = vcmask 519168  }
   0x2   :  { %152 = vmatpush3.bf16.msra.mxu0 %v161_v1  ;;  %v24_v3 = vld [vmem:[%s215_s0] sm:$0xff]  ;;  %v25_v4 = vld [vmem:[%s215_s0 + $0x8] sm:$0xff] }
   0x3   :  { %153 = vmatprep.subr.bf16.mxu0 %v167_v0  ;;  %v26_v5 = vpack.c.bf16 %v25_v4, %v24_v3  ;;  %v143_v14 = vld [vmem:[%s216_s2] ss:$0 sm:$0xff] }
   0x6   :  { %154 = vmatpush3.bf16.msra.mxu0 %v162_v2 }
   0x8   :  { %v22_v6 = vld [vmem:[#allocation2] sm:$0xff]  ;;  %v23_v8 = vld [vmem:[#allocation2 + $0x8] sm:$0xff] }
   0x9   :  { %156 = vmatmul.mubr.msk.bf16.vlgmr.msra.gmra.mrb[0].mxu0 %vm43_vm2, %v26_v5 }
  0xdc   :  { %v81_v7 = vpop.f32.mrb[0].mxu0 }
  0xdd   :  { %v88_v9 = vadd.f32 %v81_v7, %v22_v6  ;;  %v157_v10 = vpop.f32.mrb[1].mxu0 }
  0xde   :  { %v84_v11 = vpop.f32.mrb[2].mxu0 }
  0xdf   :  { %91 = vst.msk [vmem:[#allocation2] sm:$0xff] %vm19_vm0, %v88_v9  ;;  %v89_v12 = vadd.f32 %v84_v11, %v23_v8  ;;  %v158_v13 = vpop.f32.mrb[3].mxu0 }
  0xe1   :  { %92 = vst.msk [vmem:[#allocation2 + $0x8] sm:$0xff] %vm19_vm0, %v89_v12 }
  0xe6   :  { %v96_v15 = vld [vmem:[#allocation2] sm:$0xff] }
  0xe7   :  { %v105_v16 = vadd.f32 %v143_v14, %v96_v15 }
  0xe8   :  { %v97_v17 = vld [vmem:[#allocation2 + $0x8] sm:$0xff] }
  0xe9   :  { %v109_v18 = vmul.f32 0.044715, %v105_v16  ;;  %v106_v19 = vadd.f32 %v143_v14, %v97_v17  ;;  %v107_v30 = vmul.f32 0.5, %v105_v16 }
  0xeb   :  { %v111_v20 = vmul.f32 %v109_v18, %v105_v16  ;;  %v110_v21 = vmul.f32 0.044715, %v106_v19  ;;  %v108_v34 = vmul.f32 0.5, %v106_v19 }
  0xed   :  { %v113_v22 = vmul.f32 %v111_v20, %v105_v16  ;;  %v112_v23 = vmul.f32 %v110_v21, %v106_v19 }
  0xef   :  { %v115_v24 = vadd.f32 %v113_v22, %v105_v16  ;;  %v114_v25 = vmul.f32 %v112_v23, %v106_v19 }
  0xf1   :  { %v117_v26 = vmul.f32 0.7978846, %v115_v24  ;;  %v116_v27 = vadd.f32 %v114_v25, %v106_v19 }
  0xf3   :  { %163 = vtanh.f32 %v117_v26  ;;  %v118_v28 = vmul.f32 0.7978846, %v116_v27 }
  0xf5   :  { %165 = vtanh.f32 %v118_v28 }
  0xfd   :  { %v164_v29 = vpop.eup %163 }
  0xfe   :  { %v121_v31 = vadd.f32 1.0, %v164_v29 }
  0xff   :  { %v166_v32 = vpop.eup %165 }
 0x100   :  { %v123_v33 = vmul.f32 %v121_v31, %v107_v30  ;;  %v122_v35 = vadd.f32 1.0, %v166_v32 }
 0x102   :  { %v146_v36 = vpack.c.bf16 %v123_v33, %v123_v33  ;;  %v124_v37 = vmul.f32 %v122_v35, %v108_v34 }
 0x104   :  { %134 = vst.msk [vmem:[%s217_s3] sm:$0xf] %vm133_vm3, %v146_v36  ;;  %v147_v38 = vpack.c.bf16 %v124_v37, %v124_v37 }
 0x106   :  { %135 = vst.msk [vmem:[%s217_s3 + $0x4] sm:$0xf] %vm133_vm3, %v147_v38 }

// kernel: intent_model_forward.17
= control target key start
LH: loop header
LB: loop body
LE: loop exit
PB: predicated region body
PF: predicated region fallthrough
CT: control target
= control target key end

     0   :  { %vm28_vm0 = vcmask 261120   ;;  %v228_v0 = vmov 0.0   ;;  %vm229_vm1 = vmmov 0   ;;  %vm72_vm2 = vcmask 523264   ;;  %s335_s1 = inlined_call_operand.vmem [shape: bf16[64,32], index: 1, kind: input, shape index: {}]   ;;  %s336_s6 = inlined_call_operand.vmem [shape: f32[16,32], index: 6, kind: output, shape index: {}]   ;;  %s337_s0 = inlined_call_operand.vmem [shape: bf16[16,64], index: 0, kind: input, shape index: {}]   ;;  %s338_s2 = inlined_call_operand.vmem [shape: f32[1,32], index: 2, kind: input, shape index: {}]   ;;  %s339_s3 = inlined_call_operand.vmem [shape: f32[16,32], index: 3, kind: input, shape index: {}]   ;;  %s340_s4 = inlined_call_operand.vmem [shape: f32[1,32], index: 4, kind: input, shape index: {}]   ;;  %s341_s5 = inlined_call_operand.vmem [shape: f32[1,32], index: 5, kind: input, shape index: {}]  }
   0x1   :  { %205 = vmatprep.subr.bf16.mxu0 %v228_v0  ;;  %v219_v1 = vld [vmem:[%s335_s1] sm:$0xff]   ;;  %213 = vmatprep.mubr.msk.bf16.mxu0 %vm229_vm1, %v228_v0  ;;  %29 = vst.msk [vmem:[%s336_s6] sm:$0xff] %vm28_vm0, %v228_v0  ;;  %30 = vst.msk [vmem:[%s336_s6 + $0x8] sm:$0xff] %vm28_vm0, %v228_v0  ;;  %v220_v2 = vld [vmem:[%s335_s1 + $0x8] sm:$0xff]  }
   0x2   :  { %206 = vmatpush3.bf16.msra.mxu0 %v219_v1  ;;  %v221_v3 = vld [vmem:[%s335_s1 + $0x10] sm:$0xff]   ;;  %v222_v4 = vld [vmem:[%s335_s1 + $0x18] sm:$0xff]   ;;  %v223_v5 = vld [vmem:[%s337_s0] sm:$0xff]  }
   0x3   :  { %207 = vmatprep.subr.bf16.mxu0 %v228_v0  ;;  %v197_v14 = vld [vmem:[%s338_s2] ss:$0 sm:$0xff]  ;;  %v137_v19 = vld [vmem:[%s339_s3 + $0x8] sm:$0xff] }
   0x4   :  { %v136_v16 = vld [vmem:[%s339_s3] sm:$0xff] }
   0x5   :  { %v198_v42 = vld [vmem:[%s340_s4] ss:$0 sm:$0xff] }
   0x6   :  { %208 = vmatpush3.bf16.msra.mxu0 %v220_v2  ;;  %v199_v44 = vld [vmem:[%s341_s5] ss:$0 sm:$0xff] }
   0x7   :  { %209 = vmatprep.subr.bf16.mxu0 %v228_v0 }
   0x8   :  { %v31_v6 = vld [vmem:[%s336_s6] sm:$0xff]  ;;  %v32_v8 = vld [vmem:[%s336_s6 + $0x8] sm:$0xff] }
   0xa   :  { %210 = vmatpush3.bf16.msra.mxu0 %v221_v3 }
   0xb   :  { %211 = vmatprep.subr.bf16.mxu0 %v228_v0 }
   0xe   :  { %212 = vmatpush3.bf16.msra.mxu0 %v222_v4 }
  0x11   :  { %214 = vmatmul.mubr.msk.bf16.vlgmr.msra.gmra.mrb[0].mxu0 %vm72_vm2, %v223_v5 }
  0xe4   :  { %v110_v7 = vpop.f32.mrb[0].mxu0 }
  0xe5   :  { %v117_v9 = vadd.f32 %v110_v7, %v31_v6  ;;  %v215_v10 = vpop.f32.mrb[1].mxu0 }
  0xe6   :  { %v113_v11 = vpop.f32.mrb[2].mxu0 }
  0xe7   :  { %120 = vst.msk [vmem:[%s336_s6] sm:$0xff] %vm28_vm0, %v117_v9  ;;  %v118_v12 = vadd.f32 %v113_v11, %v32_v8  ;;  %v216_v13 = vpop.f32.mrb[3].mxu0 }
  0xe9   :  { %121 = vst.msk [vmem:[%s336_s6 + $0x8] sm:$0xff] %vm28_vm0, %v118_v12 }
  0xee   :  { %v125_v15 = vld [vmem:[%s336_s6] sm:$0xff] }
  0xef   :  { %v134_v17 = vadd.f32 %v197_v14, %v125_v15 }
  0xf0   :  { %v126_v18 = vld [vmem:[%s336_s6 + $0x8] sm:$0xff] }
  0xf1   :  { %v138_v20 = vadd.f32 %v136_v16, %v134_v17  ;;  %v135_v21 = vadd.f32 %v197_v14, %v126_v18 }
  0xf3   :  { %v140_v22 = vsel %vm28_vm0, %v138_v20, 0.0  ;;  %v139_v23 = vadd.f32 %v137_v19, %v135_v21 }
  0xf4   :  { %141 = vadd.xlane.f32.xlu0 %v140_v22 }
  0xf5   :  { %v143_v24 = vsel %vm28_vm0, %v139_v23, 0.0 }
  0xf8   :  { %144 = vadd.xlane.f32.xlu0 %v143_v24 }
 0x181   :  { %v142_v25 = vpop.xlane.xlu0 %141 }
 0x182   :  { %v147_v26 = vmul.f32 0.03125, %v142_v25 }
 0x184   :  { %v149_v27 = vsub.f32 %v138_v20, %v147_v26 }
 0x185   :  { %v145_v28 = vpop.xlane.xlu0 %144 }
 0x186   :  { %v148_v29 = vmul.f32 0.03125, %v145_v28  ;;  %v151_v30 = vmul.f32 %v149_v27, %v149_v27 }
 0x188   :  { %v150_v31 = vsub.f32 %v139_v23, %v148_v29  ;;  %v153_v32 = vsel %vm28_vm0, %v151_v30, 0.0 }
 0x189   :  { %154 = vadd.xlane.f32.xlu1 %v153_v32 }
 0x18a   :  { %v152_v33 = vmul.f32 %v150_v31, %v150_v31 }
 0x18c   :  { %v156_v34 = vsel %vm28_vm0, %v152_v33, 0.0 }
 0x18d   :  { %157 = vadd.xlane.f32.xlu1 %v156_v34 }
 0x216   :  { %v155_v35 = vpop.xlane.xlu1 %154 }
 0x217   :  { %v159_v36 = vmul.f32 0.03125, %v155_v35 }
 0x219   :  { %v161_v37 = vadd.f32 1e-12, %v159_v36 }
 0x21a   :  { %v158_v38 = vpop.xlane.xlu1 %157 }
 0x21b   :  { %224 = vrsqrt.f32 %v161_v37  ;;  %v160_v39 = vmul.f32 0.03125, %v158_v38 }
 0x21d   :  { %v162_v40 = vadd.f32 1e-12, %v160_v39 }
 0x21f   :  { %226 = vrsqrt.f32 %v162_v40 }
 0x225   :  { %v225_v41 = vpop.eup %224 }
 0x226   :  { %v165_v43 = vmul.f32 %v225_v41, %v149_v27 }
 0x228   :  { %v174_v45 = vmul.f32 %v198_v42, %v165_v43 }
 0x229   :  { %v227_v46 = vpop.eup %226 }
 0x22a   :  { %v183_v47 = vadd.f32 %v199_v44, %v174_v45  ;;  %v166_v48 = vmul.f32 %v227_v46, %v150_v31 }
 0x22c   :  { %185 = vst.msk [vmem:[%s336_s6] sm:$0xff] %vm28_vm0, %v183_v47  ;;  %v175_v49 = vmul.f32 %v198_v42, %v166_v48 }
 0x22e   :  { %v184_v50 = vadd.f32 %v199_v44, %v175_v49 }
 0x230   :  { %186 = vst.msk [vmem:[%s336_s6 + $0x8] sm:$0xff] %vm28_vm0, %v184_v50 }

// kernel: intent_model_forward.23
= control target key start
LH: loop header
LB: loop body
LE: loop exit
PB: predicated region body
PF: predicated region fallthrough
CT: control target
= control target key end

     0   :  { %v238_v1 = vmov 0.0   ;;  %vm239_vm0 = vmmov 0   ;;  %s306_s0 = inlined_call_operand.vmem [shape: f32[2,32], index: 0, kind: input, shape index: {}]   ;;  %s307_s1 = inlined_call_operand.vmem [shape: bf16[32,32], index: 1, kind: input, shape index: {}]   ;;  %s308_s2 = inlined_call_operand.vmem [shape: f32[1,32], index: 2, kind: input, shape index: {}]   ;;  %s309_s3 = inlined_call_operand.vmem [shape: bf16[32,4], index: 3, kind: input, shape index: {}]   ;;  %s310_s4 = inlined_call_operand.vmem [shape: f32[1,4], index: 4, kind: input, shape index: {}]   ;;  %s311_s5 = inlined_call_operand.hbm [shape: f32[2,4], index: 5, kind: output, shape index: {}]  }
   0x1   :  { %v208_v0 = vld [vmem:[%s307_s1] sm:$0xff]   ;;  %189 = vmatprep.subr.bf16.mxu0 %v238_v1  ;;  %197 = vmatprep.subr.bf16.mxu1 %v238_v1  ;;  %v209_v2 = vld [vmem:[%s307_s1 + $0x8] sm:$0xff]  }
   0x2   :  { %190 = vmatpush3.bf16.msra.mxu0 %v208_v0  ;;  %193 = vmatprep.mubr.msk.bf16.mxu0 %vm239_vm0, %v238_v1  ;;  %v22_v3 = vld [vmem:[%s306_s0] sm:$0x3] }
   0x3   :  { %191 = vmatprep.subr.bf16.mxu0 %v238_v1  ;;  %201 = vmatprep.mubr.msk.bf16.mxu1 %vm239_vm0, %v238_v1 }
   0x4   :  { %10 = vsyncpa [#allocation3], 0  ;;  %v23_v4 = vpack.c.bf16 %v22_v3, %v22_v3  ;;  %vm47_vm1 = vcmask 261120   ;;  %v210_v5 = vld [vmem:[%s309_s3] sm:$0xff]   ;;  %v211_v6 = vld [vmem:[%s309_s3 + $0x8] sm:$0xff]   ;;  %s240_s3 = smov [#allocation2]  }
   0x5   :  { %198 = vmatpush3.bf16.msra.mxu1 %v210_v5  ;;  %v175_v7 = vld [vmem:[%s308_s2] ss:$0 sm:$0xff]  ;;  %s167_s30 = sshll.u32 %s240_s3, 4  ;;  %vm159_vm2 = vcmask 25600   ;;  %s168_s30 = int_to_ptr.vmem [resolvable:$true] %s167_s30 }
   0x6   :  { %192 = vmatpush3.bf16.msra.mxu0 %v209_v2  ;;  %199 = vmatprep.subr.bf16.mxu1 %v238_v1  ;;  %v179_v15 = vld [vmem:[%s310_s4] ss:$0 sm:$0xff]  ;;  %s214_s2 = scalar_lea.vmem %s168_s30, 32  ;;  %p219_p1 = scmp.lt.s32.totalorder %s168_s30, %s168_s30 }
   0x7   :  { %p215_p0 = scmp.ne.s32.totalorder %s168_s30, %s214_s2  ;;  %p220_p2 = scmp.lt.s32.totalorder %s214_s2, %s214_s2 }
   0x9   :  { %194 = vmatmul.mubr.msk.bf16.vlgmr.msra.gmra.mrb[0].mxu0 %vm47_vm1, %v23_v4  ;;  %200 = vmatpush3.bf16.msra.mxu1 %v211_v6  ;;  %p221_p3 = por %p220_p2, %p219_p1 }
   0xb   :  { %p222_p4 = pnand %p221_p3, %p215_p0 }
  0xdc   :  { %v85_v8 = vpop.f32.mrb[0].mxu0 }
  0xdd   :  { %v86_v9 = vadd.f32 %v175_v7, %v85_v8  ;;  %v195_v10 = vpop.f32.mrb[1].mxu0 }
  0xde   :  { %v88_v11 = vpop.f32.mrb[2].mxu0 }
  0xdf   :  { %212 = vtanh.f32 %v86_v9  ;;  %v196_v12 = vpop.f32.mrb[3].mxu0 }
  0xe9   :  { %v213_v13 = vpop.eup %212 }
  0xea   :  { %v92_v14 = vpack.c.bf16 %v213_v13, %v213_v13 }
  0xec   :  { %202 = vmatmul.mubr.msk.bf16.vlgmr.msra.gmra.mrb[0].mxu1 %vm47_vm1, %v92_v14 }
 0x1bf   :  { %v153_v16 = vpop.f32.mrb[0].mxu1 }
 0x1c0   :  { %v154_v17 = vadd.f32 %v179_v15, %v153_v16  ;;  %v203_v18 = vpop.f32.mrb[1].mxu1 }
 0x1c1   :  { %v156_v19 = vpop.f32.mrb[2].mxu1 }
 0x1c2   :  { %v204_v20 = vpop.f32.mrb[3].mxu1  ;;  %160 = vst.msk [vmem:[#allocation2] sm:$0x3] %vm159_vm2, %v154_v17 }
 0x1c3   :  { %225 = shalt.err (!%p222_p4)
}
 0x1c4   :  { %s226_s4 = scalar_lea.hbm %s311_s5, 32 }
 0x1c5   :  { %p227_p5 = scmp.ne.s32.totalorder %s311_s5, %s226_s4  ;;  %p230_p6 = scmp.lt.u32.totalorder %s226_s4, %s311_s5 }
 0x1c7   :  { %p232_p7 = pnand %p230_p6, %p227_p5 }
 0x1c9   :  { %235 = shalt.err (!%p232_p7)
}
 0x1ca   :  { %170 = dma.vmem_to_hbm [thread:$0]  %s168_s30, 32, %s311_s5, [#allocation3]  }
 0x1cb   :  { %236 = dma.done.wait [#allocation3], 32  }
 0x1cc   :  { %237 = vsyncadd [#allocation3], 4294967264 }
 0x1cd   :  { %174 = vsyncpa [#allocation3], 1 }

</bundles_post_ra>
